<compile_context>
chip_gen: v7x
topology: tpu7x:2x2x1
jax: 0.10.0
libtpu: 0.0.40
codegen_flags: <defaults>
</compile_context>

<pallas_src>
import jax
import jax.numpy as jnp
from jax.experimental import pallas as pl
from jax.experimental.pallas import tpu as pltpu


# ----------------------------------------------------------------------------
# Pallas kernels
# ----------------------------------------------------------------------------
def conv_bn_relu_pool_kernel(p_ref, w_ref, shift_ref, o_ref):
    """Fused Conv (one merged im2col matmul) + eval-BN (scale pre-folded into w)
    + ReLU + MaxPool2d(3), spatial-on-lanes layout.

    p_ref:     (1, K, 9*Mp)   bf16 patches; lane index = a*Mp + m (a = pool pos)
    w_ref:     (Cout, K)      bf16 conv weight with BN scale folded in
    shift_ref: (Cout, 1)      f32  BN shift (conv bias folded in)
    o_ref:     (1, Cout, Mp)  bf16 pooled output (Mp padded to a multiple of 128)
    """
    mp = o_ref.shape[2]
    npos = p_ref.shape[2] // mp                      # 9 pool-window positions
    # One MXU push: (Cout, K) @ (K, 9*Mp) with f32 accumulation.
    acc = jnp.dot(w_ref[...], p_ref[0], preferred_element_type=jnp.float32)
    best = acc[:, 0:mp]
    for a in range(1, npos):                         # lane-tile-aligned slices
        best = jnp.maximum(best, acc[:, a * mp:(a + 1) * mp])
    o_ref[0] = jnp.maximum(best + shift_ref[...], 0.0).astype(o_ref.dtype)


def conv3_mlp_kernel(p_ref, wc_ref, sc_ref, w1_ref, b1_ref, w2_ref, b2_ref,
                     w3_ref, b3_ref, o_ref):
    """Fused conv3+BN+ReLU+pool -> NCHW flatten -> fc1+ReLU -> fc2+ReLU -> fc3.

    p_ref:  (9*Mp3*N, K3)   bf16 patches, rows ordered (pool pos a, spatial m, image n)
    wc_ref: (K3, C3)        bf16 conv3 weight (BN scale folded)
    sc_ref: (1, C3)         f32  conv3 BN shift
    w1_ref: (Mp3, C3, H1)   bf16 fc1 weight regrouped per pooled spatial position,
                            so the NCHW flatten is absorbed into partial matmuls.
    b1_ref/b2_ref/b3_ref:   (1, n_out) f32 biases;  w2_ref/w3_ref: (in, out) bf16
    o_ref:  (N, 30)         f32
    """
    n = o_ref.shape[0]
    mp3 = w1_ref.shape[0]
    grp = mp3 * n
    npos = p_ref.shape[0] // grp                     # 9
    acc = jnp.dot(p_ref[...], wc_ref[...], preferred_element_type=jnp.float32)
    best = acc[0:grp, :]
    for a in range(1, npos):                         # sublane-tile-aligned slices
        best = jnp.maximum(best, acc[a * grp:(a + 1) * grp, :])
    z = jnp.maximum(best + sc_ref[...], 0.0)         # (Mp3*N, C3), rows = (m, n)

    # fc1 == sum over pooled spatial positions of (N, C3) @ (C3, H1) partials;
    # equivalent to Linear over the PyTorch x.view(N, -1) flatten (weight was
    # regrouped in the wrapper).  Dropout = identity in eval mode.
    h = jnp.dot(z[0:n, :].astype(jnp.bfloat16), w1_ref[0],
                preferred_element_type=jnp.float32)
    for m in range(1, mp3):
        h = h + jnp.dot(z[m * n:(m + 1) * n, :].astype(jnp.bfloat16), w1_ref[m],
                        preferred_element_type=jnp.float32)
    h = jnp.maximum(h + b1_ref[...], 0.0).astype(jnp.bfloat16)
    h = jnp.maximum(jnp.dot(h, w2_ref[...], preferred_element_type=jnp.float32)
                    + b2_ref[...], 0.0).astype(jnp.bfloat16)
    o_ref[...] = (jnp.dot(h, w3_ref[...], preferred_element_type=jnp.float32)
                  + b3_ref[...])


# ----------------------------------------------------------------------------
# JAX glue: im2col grouped by pool-window position + parameter folding
# ----------------------------------------------------------------------------
def _im2col_pool_groups(x, k):
    """x: (N,C,H,W) -> (N, K, 9, Mp); K in (ci,kh,kw) order (matches a PyTorch conv
    weight reshaped to (Cout, Cin*kh*kw)); axis 2 = 3x3 pool-window position;
    axis 3 = pooled spatial position m = hp*Wp + wp (floor-mode MaxPool2d(3))."""
    N, C, H, W = x.shape
    Ho, Wo = H - k + 1, W - k + 1
    Hp, Wp = Ho // 3, Wo // 3
    cols = [x[:, :, i:i + Ho, j:j + Wo] for i in range(k) for j in range(k)]
    p = jnp.stack(cols, axis=2)                      # (N, C, k*k, Ho, Wo)
    p = p.reshape(N, C * k * k, Ho, Wo)              # (ci, kh, kw) feature order
    p = p[:, :, :3 * Hp, :3 * Wp]                    # crop ragged pool tail
    p = p.reshape(N, C * k * k, Hp, 3, Wp, 3)
    p = p.transpose(0, 1, 3, 5, 2, 4)                # (N, K, 3, 3, Hp, Wp)
    return p.reshape(N, C * k * k, 9, Hp * Wp), (Hp, Wp)


def _fold_bn(c, eps=1e-5):
    """Fold eval BN into the conv: scale -> weights (f32 mul, one bf16 cast),
    conv-bias + BN shift -> per-channel f32 shift."""
    cout = c["w"].shape[0]
    scale = c["gamma"] / jnp.sqrt(c["var"] + eps)                      # f32
    wmat = (c["w"].reshape(cout, -1) * scale[:, None]).astype(jnp.bfloat16)
    shift = c["beta"] + (c["b"] - c["mean"]) * scale                   # f32
    return wmat, shift                                                 # (Cout,K), (Cout,)


def conv_bn_relu_pool(x, c):
    """Conv2d(valid)+BatchNorm2d(eval)+ReLU+MaxPool2d(3) as one Pallas call (NCHW)."""
    k, cout, N = c["w"].shape[2], c["w"].shape[0], x.shape[0]
    p, (Hp, Wp) = _im2col_pool_groups(x, k)          # (N, K, 9, Mp) bf16
    K, Mp = p.shape[1], p.shape[3]
    mp_pad = ((Mp + 127) // 128) * 128               # lane-dense stores + aligned max
    p = jnp.pad(p, ((0, 0), (0, 0), (0, 0), (0, mp_pad - Mp)))
    p = p.reshape(N, K, 9 * mp_pad)                  # lane index = a*mp_pad + m
    wmat, shift = _fold_bn(c)
    out = pl.pallas_call(
        conv_bn_relu_pool_kernel,
        out_shape=jax.ShapeDtypeStruct((N, cout, mp_pad), jnp.bfloat16),
        grid=(N,),
        in_specs=[
            pl.BlockSpec((1, K, 9 * mp_pad), lambda n: (n, 0, 0)),
            pl.BlockSpec((cout, K), lambda n: (0, 0)),
            pl.BlockSpec((cout, 1), lambda n: (0, 0)),
        ],
        out_specs=pl.BlockSpec((1, cout, mp_pad), lambda n: (n, 0, 0)),
        compiler_params=pltpu.CompilerParams(dimension_semantics=("parallel",)),
    )(p, wmat, shift.reshape(cout, 1))
    return out[:, :, :Mp].reshape(N, cout, Hp, Wp)   # already NCHW for next stage


def conv3_classifier(x, c3, fc1, fc2, fc3):
    """conv3 stage + NCHW flatten + classifier MLP fused into one Pallas call."""
    N = x.shape[0]
    k, cout = c3["w"].shape[2], c3["w"].shape[0]
    p, _ = _im2col_pool_groups(x, k)                 # (N, K, 9, Mp)
    K, Mp = p.shape[1], p.shape[3]
    # Rows ordered (pool pos, spatial, image) -> aligned row slices in the kernel.
    p = p.transpose(2, 3, 0, 1).reshape(9 * Mp * N, K)
    wmat, shift = _fold_bn(c3)
    wc_t = wmat.T                                    # (K, Cout) bf16
    sc = shift.reshape(1, cout)

    h1 = fc1["w"].shape[0]                           # 128
    # Regroup fc1 weight so feature index c*Mp + m (PyTorch NCHW flatten) becomes
    # one (Cout, h1) slab per pooled spatial position m -> no in-kernel reshape.
    w1stk = (fc1["w"].reshape(h1, cout, Mp)
             .transpose(2, 1, 0).astype(jnp.bfloat16))       # (Mp, Cout, 128)
    w2 = fc2["w"].T.astype(jnp.bfloat16)                      # (128, 64)
    w3 = fc3["w"].T.astype(jnp.bfloat16)                      # (64, 30)
    b1 = fc1["b"].reshape(1, -1)
    b2 = fc2["b"].reshape(1, -1)
    b3 = fc3["b"].reshape(1, -1)
    n_out = w3.shape[1]

    def full(shape):
        return pl.BlockSpec(tuple(shape), lambda i: (0,) * len(shape))

    return pl.pallas_call(
        conv3_mlp_kernel,
        out_shape=jax.ShapeDtypeStruct((N, n_out), jnp.float32),
        grid=(1,),
        in_specs=[full(p.shape), full(wc_t.shape), full(sc.shape),
                  full(w1stk.shape), full(b1.shape), full(w2.shape),
                  full(b2.shape), full(w3.shape), full(b3.shape)],
        out_specs=full((N, n_out)),
        compiler_params=pltpu.CompilerParams(dimension_semantics=("arbitrary",)),
    )(p, wc_t, sc, w1stk, b1, w2, b2, w3, b3)


# ----------------------------------------------------------------------------
# Deterministic parameter initialization (synthetic, mirrors module shapes)
# ----------------------------------------------------------------------------
def init_params(key):
    ks = iter(jax.random.split(key, 32))
    p = {}

    def conv_block(cout, cin, k):
        return {
            "w": 0.1 * jax.random.normal(next(ks), (cout, cin, k, k), jnp.float32),
            "b": 0.1 * jax.random.normal(next(ks), (cout,), jnp.float32),
            "gamma": 1.0 + 0.1 * jax.random.normal(next(ks), (cout,), jnp.float32),
            "beta": 0.1 * jax.random.normal(next(ks), (cout,), jnp.float32),
            "mean": 0.1 * jax.random.normal(next(ks), (cout,), jnp.float32),
            "var": jax.random.uniform(next(ks), (cout,), jnp.float32, 0.5, 1.5),
        }

    def lin(n_out, n_in):
        return {
            "w": 0.1 * jax.random.normal(next(ks), (n_out, n_in), jnp.float32),
            "b": 0.1 * jax.random.normal(next(ks), (n_out,), jnp.float32),
        }

    p["conv1"] = conv_block(16, 1, 4)
    p["conv2"] = conv_block(32, 16, 3)
    p["conv3"] = conv_block(64, 32, 3)
    p["fc1"] = lin(128, 64 * 2 * 2)
    p["fc2"] = lin(64, 128)
    p["fc3"] = lin(30, 64)
    return p


# ----------------------------------------------------------------------------
# Full forward pass (eval mode)
# ----------------------------------------------------------------------------
def keypoint_model_forward(x_nchw, p):
    x = x_nchw.astype(jnp.bfloat16)                  # NCHW throughout; f32 acc in kernels
    x = conv_bn_relu_pool(x, p["conv1"])
    x = conv_bn_relu_pool(x, p["conv2"])
    return conv3_classifier(x, p["conv3"], p["fc1"], p["fc2"], p["fc3"])  # (N, 30) f32


if __name__ == "__main__":
    key = jax.random.PRNGKey(0)
    k_x, k_p = jax.random.split(key)

    # Input spatial size must produce a 2x2 conv3 feature map (classifier expects
    # 64*2*2), i.e. the canonical 96x96 single-channel keypoint images.
    x = jax.random.normal(k_x, (2, 1, 96, 96), jnp.float32)
    params = init_params(k_p)

    fwd = jax.jit(keypoint_model_forward)
    out = jax.block_until_ready(fwd(x, params))

    assert out.shape == (2, 30), out.shape
    assert out.dtype == jnp.float32
    assert bool(jnp.all(jnp.isfinite(out)))
    print("KERNEL_OK")
</pallas_src>

<mosaic_0001>
module attributes {stable_mosaic.version = 11 : i64} {
  func.func @conv_bn_relu_pool_kernel(%arg0: i32, %arg1: memref<1x16x9216xbf16, #tpu.memory_space<vmem>>, %arg2: memref<16x16xbf16, #tpu.memory_space<vmem>>, %arg3: memref<16x1xf32, #tpu.memory_space<vmem>>, %arg4: memref<1x16x1024xbf16, #tpu.memory_space<vmem>>) attributes {dimension_semantics = [#tpu.dimension_semantics<parallel>], iteration_bounds = array<i64: 2>, scalar_prefetch = 0 : i64, scratch_operands = 0 : i64, tpu.core_type = #tpu.core_type<tc>, window_params = [{transform_indices = @transform_0, window_bounds = array<i64: 1, 16, 9216>}, {pipeline_mode = #tpu.pipeline_mode<synchronous>, transform_indices = @transform_1, window_bounds = array<i64: 16, 16>}, {pipeline_mode = #tpu.pipeline_mode<synchronous>, transform_indices = @transform_2, window_bounds = array<i64: 16, 1>}, {transform_indices = @transform_3, window_bounds = array<i64: 1, 16, 1024>}]} {
    %c0 = arith.constant 0 : index
    %c0_0 = arith.constant 0 : index
    %0 = vector.load %arg2[%c0, %c0_0] : memref<16x16xbf16, #tpu.memory_space<vmem>>, vector<16x16xbf16>
    %c0_1 = arith.constant 0 : index
    %c0_2 = arith.constant 0 : index
    %c0_3 = arith.constant 0 : index
    %1 = vector.load %arg1[%c0_1, %c0_2, %c0_3] : memref<1x16x9216xbf16, #tpu.memory_space<vmem>>, vector<1x16x9216xbf16>
    %2 = vector.shape_cast %1 : vector<1x16x9216xbf16> to vector<16x9216xbf16>
    %cst = arith.constant dense<0.000000e+00> : vector<16x9216xf32>
    %3 = tpu.matmul %0, %2, %cst {dimension_numbers = #tpu.dot_dimension_numbers<[1], [0], [0], [1], [0, 0, 1, 1], [], []>} : vector<16x16xbf16>, vector<16x9216xbf16>, vector<16x9216xf32> -> vector<16x9216xf32>
    %4 = vector.extract_strided_slice %3 {offsets = [0, 0], sizes = [16, 1024], strides = [1, 1]} : vector<16x9216xf32> to vector<16x1024xf32>
    %5 = vector.extract_strided_slice %3 {offsets = [0, 1024], sizes = [16, 1024], strides = [1, 1]} : vector<16x9216xf32> to vector<16x1024xf32>
    %6 = arith.maximumf %4, %5 : vector<16x1024xf32>
    %7 = vector.extract_strided_slice %3 {offsets = [0, 2048], sizes = [16, 1024], strides = [1, 1]} : vector<16x9216xf32> to vector<16x1024xf32>
    %8 = arith.maximumf %6, %7 : vector<16x1024xf32>
    %9 = vector.extract_strided_slice %3 {offsets = [0, 3072], sizes = [16, 1024], strides = [1, 1]} : vector<16x9216xf32> to vector<16x1024xf32>
    %10 = arith.maximumf %8, %9 : vector<16x1024xf32>
    %11 = vector.extract_strided_slice %3 {offsets = [0, 4096], sizes = [16, 1024], strides = [1, 1]} : vector<16x9216xf32> to vector<16x1024xf32>
    %12 = arith.maximumf %10, %11 : vector<16x1024xf32>
    %13 = vector.extract_strided_slice %3 {offsets = [0, 5120], sizes = [16, 1024], strides = [1, 1]} : vector<16x9216xf32> to vector<16x1024xf32>
    %14 = arith.maximumf %12, %13 : vector<16x1024xf32>
    %15 = vector.extract_strided_slice %3 {offsets = [0, 6144], sizes = [16, 1024], strides = [1, 1]} : vector<16x9216xf32> to vector<16x1024xf32>
    %16 = arith.maximumf %14, %15 : vector<16x1024xf32>
    %17 = vector.extract_strided_slice %3 {offsets = [0, 7168], sizes = [16, 1024], strides = [1, 1]} : vector<16x9216xf32> to vector<16x1024xf32>
    %18 = arith.maximumf %16, %17 : vector<16x1024xf32>
    %19 = vector.extract_strided_slice %3 {offsets = [0, 8192], sizes = [16, 1024], strides = [1, 1]} : vector<16x9216xf32> to vector<16x1024xf32>
    %20 = arith.maximumf %18, %19 : vector<16x1024xf32>
    %c0_4 = arith.constant 0 : index
    %c0_5 = arith.constant 0 : index
    %21 = vector.load %arg3[%c0_4, %c0_5] : memref<16x1xf32, #tpu.memory_space<vmem>>, vector<16x1xf32>
    %22 = vector.broadcast %21 : vector<16x1xf32> to vector<16x1024xf32>
    %23 = arith.addf %20, %22 : vector<16x1024xf32>
    %cst_6 = arith.constant 0.000000e+00 : f32
    %24 = vector.broadcast %cst_6 : f32 to vector<16x1024xf32>
    %25 = arith.maximumf %23, %24 : vector<16x1024xf32>
    %26 = arith.truncf %25 : vector<16x1024xf32> to vector<16x1024xbf16>
    %c0_7 = arith.constant 0 : index
    %c0_8 = arith.constant 0 : index
    %c0_9 = arith.constant 0 : index
    %27 = vector.load %arg4[%c0_7, %c0_8, %c0_9] : memref<1x16x1024xbf16, #tpu.memory_space<vmem>>, vector<1x16x1024xbf16>
    %28 = vector.shape_cast %27 : vector<1x16x1024xbf16> to vector<16x1024xbf16>
    %29 = vector.shape_cast %26 : vector<16x1024xbf16> to vector<1x16x1024xbf16>
    tpu.vector_store %arg4[%c0_7, %c0_8, %c0_9], %29 {strides = array<i32>} : memref<1x16x1024xbf16, #tpu.memory_space<vmem>>, vector<1x16x1024xbf16>,
    return
  }
  func.func @transform_0(%arg0: i32) -> (i32, i32, i32) {
    %c0_i32 = arith.constant 0 : i32
    %c0_i32_0 = arith.constant 0 : i32
    %c0_i32_1 = arith.constant 0 : i32
    return %arg0, %c0_i32, %c0_i32_0 : i32, i32, i32
  }
  func.func @transform_1(%arg0: i32) -> (i32, i32) {
    %c0_i32 = arith.constant 0 : i32
    %c0_i32_0 = arith.constant 0 : i32
    %c0_i32_1 = arith.constant 0 : i32
    return %c0_i32, %c0_i32_0 : i32, i32
  }
  func.func @transform_2(%arg0: i32) -> (i32, i32) {
    %c0_i32 = arith.constant 0 : i32
    %c0_i32_0 = arith.constant 0 : i32
    %c0_i32_1 = arith.constant 0 : i32
    return %c0_i32, %c0_i32_0 : i32, i32
  }
  func.func @transform_3(%arg0: i32) -> (i32, i32, i32) {
    %c0_i32 = arith.constant 0 : i32
    %c0_i32_0 = arith.constant 0 : i32
    %c0_i32_1 = arith.constant 0 : i32
    return %arg0, %c0_i32, %c0_i32_0 : i32, i32, i32
  }
}

module attributes {stable_mosaic.version = 11 : i64} {
  func.func @conv_bn_relu_pool_kernel(%arg0: i32, %arg1: memref<1x144x1152xbf16, #tpu.memory_space<vmem>>, %arg2: memref<32x144xbf16, #tpu.memory_space<vmem>>, %arg3: memref<32x1xf32, #tpu.memory_space<vmem>>, %arg4: memref<1x32x128xbf16, #tpu.memory_space<vmem>>) attributes {dimension_semantics = [#tpu.dimension_semantics<parallel>], iteration_bounds = array<i64: 2>, scalar_prefetch = 0 : i64, scratch_operands = 0 : i64, tpu.core_type = #tpu.core_type<tc>, window_params = [{transform_indices = @transform_0, window_bounds = array<i64: 1, 144, 1152>}, {pipeline_mode = #tpu.pipeline_mode<synchronous>, transform_indices = @transform_1, window_bounds = array<i64: 32, 144>}, {pipeline_mode = #tpu.pipeline_mode<synchronous>, transform_indices = @transform_2, window_bounds = array<i64: 32, 1>}, {transform_indices = @transform_3, window_bounds = array<i64: 1, 32, 128>}]} {
    %c0 = arith.constant 0 : index
    %c0_0 = arith.constant 0 : index
    %0 = vector.load %arg2[%c0, %c0_0] : memref<32x144xbf16, #tpu.memory_space<vmem>>, vector<32x144xbf16>
    %c0_1 = arith.constant 0 : index
    %c0_2 = arith.constant 0 : index
    %c0_3 = arith.constant 0 : index
    %1 = vector.load %arg1[%c0_1, %c0_2, %c0_3] : memref<1x144x1152xbf16, #tpu.memory_space<vmem>>, vector<1x144x1152xbf16>
    %2 = vector.shape_cast %1 : vector<1x144x1152xbf16> to vector<144x1152xbf16>
    %cst = arith.constant dense<0.000000e+00> : vector<32x1152xf32>
    %3 = tpu.matmul %0, %2, %cst {dimension_numbers = #tpu.dot_dimension_numbers<[1], [0], [0], [1], [0, 0, 1, 1], [], []>} : vector<32x144xbf16>, vector<144x1152xbf16>, vector<32x1152xf32> -> vector<32x1152xf32>
    %4 = vector.extract_strided_slice %3 {offsets = [0, 0], sizes = [32, 128], strides = [1, 1]} : vector<32x1152xf32> to vector<32x128xf32>
    %5 = vector.extract_strided_slice %3 {offsets = [0, 128], sizes = [32, 128], strides = [1, 1]} : vector<32x1152xf32> to vector<32x128xf32>
    %6 = arith.maximumf %4, %5 : vector<32x128xf32>
    %7 = vector.extract_strided_slice %3 {offsets = [0, 256], sizes = [32, 128], strides = [1, 1]} : vector<32x1152xf32> to vector<32x128xf32>
    %8 = arith.maximumf %6, %7 : vector<32x128xf32>
    %9 = vector.extract_strided_slice %3 {offsets = [0, 384], sizes = [32, 128], strides = [1, 1]} : vector<32x1152xf32> to vector<32x128xf32>
    %10 = arith.maximumf %8, %9 : vector<32x128xf32>
    %11 = vector.extract_strided_slice %3 {offsets = [0, 512], sizes = [32, 128], strides = [1, 1]} : vector<32x1152xf32> to vector<32x128xf32>
    %12 = arith.maximumf %10, %11 : vector<32x128xf32>
    %13 = vector.extract_strided_slice %3 {offsets = [0, 640], sizes = [32, 128], strides = [1, 1]} : vector<32x1152xf32> to vector<32x128xf32>
    %14 = arith.maximumf %12, %13 : vector<32x128xf32>
    %15 = vector.extract_strided_slice %3 {offsets = [0, 768], sizes = [32, 128], strides = [1, 1]} : vector<32x1152xf32> to vector<32x128xf32>
    %16 = arith.maximumf %14, %15 : vector<32x128xf32>
    %17 = vector.extract_strided_slice %3 {offsets = [0, 896], sizes = [32, 128], strides = [1, 1]} : vector<32x1152xf32> to vector<32x128xf32>
    %18 = arith.maximumf %16, %17 : vector<32x128xf32>
    %19 = vector.extract_strided_slice %3 {offsets = [0, 1024], sizes = [32, 128], strides = [1, 1]} : vector<32x1152xf32> to vector<32x128xf32>
    %20 = arith.maximumf %18, %19 : vector<32x128xf32>
    %c0_4 = arith.constant 0 : index
    %c0_5 = arith.constant 0 : index
    %21 = vector.load %arg3[%c0_4, %c0_5] : memref<32x1xf32, #tpu.memory_space<vmem>>, vector<32x1xf32>
    %22 = vector.broadcast %21 : vector<32x1xf32> to vector<32x128xf32>
    %23 = arith.addf %20, %22 : vector<32x128xf32>
    %cst_6 = arith.constant 0.000000e+00 : f32
    %24 = vector.broadcast %cst_6 : f32 to vector<32x128xf32>
    %25 = arith.maximumf %23, %24 : vector<32x128xf32>
    %26 = arith.truncf %25 : vector<32x128xf32> to vector<32x128xbf16>
    %c0_7 = arith.constant 0 : index
    %c0_8 = arith.constant 0 : index
    %c0_9 = arith.constant 0 : index
    %27 = vector.load %arg4[%c0_7, %c0_8, %c0_9] : memref<1x32x128xbf16, #tpu.memory_space<vmem>>, vector<1x32x128xbf16>
    %28 = vector.shape_cast %27 : vector<1x32x128xbf16> to vector<32x128xbf16>
    %29 = vector.shape_cast %26 : vector<32x128xbf16> to vector<1x32x128xbf16>
    tpu.vector_store %arg4[%c0_7, %c0_8, %c0_9], %29 {strides = array<i32>} : memref<1x32x128xbf16, #tpu.memory_space<vmem>>, vector<1x32x128xbf16>,
    return
  }
  func.func @transform_0(%arg0: i32) -> (i32, i32, i32) {
    %c0_i32 = arith.constant 0 : i32
    %c0_i32_0 = arith.constant 0 : i32
    %c0_i32_1 = arith.constant 0 : i32
    return %arg0, %c0_i32, %c0_i32_0 : i32, i32, i32
  }
  func.func @transform_1(%arg0: i32) -> (i32, i32) {
    %c0_i32 = arith.constant 0 : i32
    %c0_i32_0 = arith.constant 0 : i32
    %c0_i32_1 = arith.constant 0 : i32
    return %c0_i32, %c0_i32_0 : i32, i32
  }
  func.func @transform_2(%arg0: i32) -> (i32, i32) {
    %c0_i32 = arith.constant 0 : i32
    %c0_i32_0 = arith.constant 0 : i32
    %c0_i32_1 = arith.constant 0 : i32
    return %c0_i32, %c0_i32_0 : i32, i32
  }
  func.func @transform_3(%arg0: i32) -> (i32, i32, i32) {
    %c0_i32 = arith.constant 0 : i32
    %c0_i32_0 = arith.constant 0 : i32
    %c0_i32_1 = arith.constant 0 : i32
    return %arg0, %c0_i32, %c0_i32_0 : i32, i32, i32
  }
}

module attributes {stable_mosaic.version = 11 : i64} {
  func.func @conv3_mlp_kernel(%arg0: i32, %arg1: memref<72x288xbf16, #tpu.memory_space<vmem>>, %arg2: memref<288x64xbf16, #tpu.memory_space<vmem>>, %arg3: memref<1x64xf32, #tpu.memory_space<vmem>>, %arg4: memref<4x64x128xbf16, #tpu.memory_space<vmem>>, %arg5: memref<1x128xf32, #tpu.memory_space<vmem>>, %arg6: memref<128x64xbf16, #tpu.memory_space<vmem>>, %arg7: memref<1x64xf32, #tpu.memory_space<vmem>>, %arg8: memref<64x30xbf16, #tpu.memory_space<vmem>>, %arg9: memref<1x30xf32, #tpu.memory_space<vmem>>, %arg10: memref<2x30xf32, #tpu.memory_space<vmem>>) attributes {dimension_semantics = [#tpu.dimension_semantics<arbitrary>], iteration_bounds = array<i64: 1>, scalar_prefetch = 0 : i64, scratch_operands = 0 : i64, tpu.core_type = #tpu.core_type<tc>, window_params = [{pipeline_mode = #tpu.pipeline_mode<synchronous>, transform_indices = @transform_0, window_bounds = array<i64: 72, 288>}, {pipeline_mode = #tpu.pipeline_mode<synchronous>, transform_indices = @transform_1, window_bounds = array<i64: 288, 64>}, {pipeline_mode = #tpu.pipeline_mode<synchronous>, transform_indices = @transform_2, window_bounds = array<i64: 1, 64>}, {pipeline_mode = #tpu.pipeline_mode<synchronous>, transform_indices = @transform_3, window_bounds = array<i64: 4, 64, 128>}, {pipeline_mode = #tpu.pipeline_mode<synchronous>, transform_indices = @transform_4, window_bounds = array<i64: 1, 128>}, {pipeline_mode = #tpu.pipeline_mode<synchronous>, transform_indices = @transform_5, window_bounds = array<i64: 128, 64>}, {pipeline_mode = #tpu.pipeline_mode<synchronous>, transform_indices = @transform_6, window_bounds = array<i64: 1, 64>}, {pipeline_mode = #tpu.pipeline_mode<synchronous>, transform_indices = @transform_7, window_bounds = array<i64: 64, 30>}, {pipeline_mode = #tpu.pipeline_mode<synchronous>, transform_indices = @transform_8, window_bounds = array<i64: 1, 30>}, {pipeline_mode = #tpu.pipeline_mode<synchronous>, transform_indices = @transform_9, window_bounds = array<i64: 2, 30>}]} {
    %c0 = arith.constant 0 : index
    %c0_0 = arith.constant 0 : index
    %0 = vector.load %arg1[%c0, %c0_0] : memref<72x288xbf16, #tpu.memory_space<vmem>>, vector<72x288xbf16>
    %c0_1 = arith.constant 0 : index
    %c0_2 = arith.constant 0 : index
    %1 = vector.load %arg2[%c0_1, %c0_2] : memref<288x64xbf16, #tpu.memory_space<vmem>>, vector<288x64xbf16>
    %cst = arith.constant dense<0.000000e+00> : vector<72x64xf32>
    %2 = tpu.matmul %0, %1, %cst {dimension_numbers = #tpu.dot_dimension_numbers<[1], [0], [0], [1], [0, 0, 1, 1], [], []>} : vector<72x288xbf16>, vector<288x64xbf16>, vector<72x64xf32> -> vector<72x64xf32>
    %3 = vector.extract_strided_slice %2 {offsets = [0, 0], sizes = [8, 64], strides = [1, 1]} : vector<72x64xf32> to vector<8x64xf32>
    %4 = vector.extract_strided_slice %2 {offsets = [8, 0], sizes = [8, 64], strides = [1, 1]} : vector<72x64xf32> to vector<8x64xf32>
    %5 = arith.maximumf %3, %4 : vector<8x64xf32>
    %6 = vector.extract_strided_slice %2 {offsets = [16, 0], sizes = [8, 64], strides = [1, 1]} : vector<72x64xf32> to vector<8x64xf32>
    %7 = arith.maximumf %5, %6 : vector<8x64xf32>
    %8 = vector.extract_strided_slice %2 {offsets = [24, 0], sizes = [8, 64], strides = [1, 1]} : vector<72x64xf32> to vector<8x64xf32>
    %9 = arith.maximumf %7, %8 : vector<8x64xf32>
    %10 = vector.extract_strided_slice %2 {offsets = [32, 0], sizes = [8, 64], strides = [1, 1]} : vector<72x64xf32> to vector<8x64xf32>
    %11 = arith.maximumf %9, %10 : vector<8x64xf32>
    %12 = vector.extract_strided_slice %2 {offsets = [40, 0], sizes = [8, 64], strides = [1, 1]} : vector<72x64xf32> to vector<8x64xf32>
    %13 = arith.maximumf %11, %12 : vector<8x64xf32>
    %14 = vector.extract_strided_slice %2 {offsets = [48, 0], sizes = [8, 64], strides = [1, 1]} : vector<72x64xf32> to vector<8x64xf32>
    %15 = arith.maximumf %13, %14 : vector<8x64xf32>
    %16 = vector.extract_strided_slice %2 {offsets = [56, 0], sizes = [8, 64], strides = [1, 1]} : vector<72x64xf32> to vector<8x64xf32>
    %17 = arith.maximumf %15, %16 : vector<8x64xf32>
    %18 = vector.extract_strided_slice %2 {offsets = [64, 0], sizes = [8, 64], strides = [1, 1]} : vector<72x64xf32> to vector<8x64xf32>
    %19 = arith.maximumf %17, %18 : vector<8x64xf32>
    %c0_3 = arith.constant 0 : index
    %c0_4 = arith.constant 0 : index
    %20 = vector.load %arg3[%c0_3, %c0_4] : memref<1x64xf32, #tpu.memory_space<vmem>>, vector<1x64xf32>
    %21 = vector.broadcast %20 : vector<1x64xf32> to vector<8x64xf32>
    %22 = arith.addf %19, %21 : vector<8x64xf32>
    %cst_5 = arith.constant 0.000000e+00 : f32
    %23 = vector.broadcast %cst_5 : f32 to vector<8x64xf32>
    %24 = arith.maximumf %22, %23 : vector<8x64xf32>
    %25 = vector.extract_strided_slice %24 {offsets = [0, 0], sizes = [2, 64], strides = [1, 1]} : vector<8x64xf32> to vector<2x64xf32>
    %26 = arith.truncf %25 : vector<2x64xf32> to vector<2x64xbf16>
    %c0_6 = arith.constant 0 : index
    %c0_7 = arith.constant 0 : index
    %c0_8 = arith.constant 0 : index
    %27 = vector.load %arg4[%c0_6, %c0_7, %c0_8] : memref<4x64x128xbf16, #tpu.memory_space<vmem>>, vector<1x64x128xbf16>
    %28 = vector.shape_cast %27 : vector<1x64x128xbf16> to vector<64x128xbf16>
    %cst_9 = arith.constant dense<0.000000e+00> : vector<2x128xf32>
    %29 = tpu.matmul %26, %28, %cst_9 {dimension_numbers = #tpu.dot_dimension_numbers<[1], [0], [0], [1], [0, 0, 1, 1], [], []>} : vector<2x64xbf16>, vector<64x128xbf16>, vector<2x128xf32> -> vector<2x128xf32>
    %30 = vector.extract_strided_slice %24 {offsets = [2, 0], sizes = [2, 64], strides = [1, 1]} : vector<8x64xf32> to vector<2x64xf32>
    %31 = arith.truncf %30 : vector<2x64xf32> to vector<2x64xbf16>
    %c1 = arith.constant 1 : index
    %c0_10 = arith.constant 0 : index
    %c0_11 = arith.constant 0 : index
    %32 = vector.load %arg4[%c1, %c0_10, %c0_11] : memref<4x64x128xbf16, #tpu.memory_space<vmem>>, vector<1x64x128xbf16>
    %33 = vector.shape_cast %32 : vector<1x64x128xbf16> to vector<64x128xbf16>
    %cst_12 = arith.constant dense<0.000000e+00> : vector<2x128xf32>
    %34 = tpu.matmul %31, %33, %cst_12 {dimension_numbers = #tpu.dot_dimension_numbers<[1], [0], [0], [1], [0, 0, 1, 1], [], []>} : vector<2x64xbf16>, vector<64x128xbf16>, vector<2x128xf32> -> vector<2x128xf32>
    %35 = arith.addf %29, %34 : vector<2x128xf32>
    %36 = vector.extract_strided_slice %24 {offsets = [4, 0], sizes = [2, 64], strides = [1, 1]} : vector<8x64xf32> to vector<2x64xf32>
    %37 = arith.truncf %36 : vector<2x64xf32> to vector<2x64xbf16>
    %c2 = arith.constant 2 : index
    %c0_13 = arith.constant 0 : index
    %c0_14 = arith.constant 0 : index
    %38 = vector.load %arg4[%c2, %c0_13, %c0_14] : memref<4x64x128xbf16, #tpu.memory_space<vmem>>, vector<1x64x128xbf16>
    %39 = vector.shape_cast %38 : vector<1x64x128xbf16> to vector<64x128xbf16>
    %cst_15 = arith.constant dense<0.000000e+00> : vector<2x128xf32>
    %40 = tpu.matmul %37, %39, %cst_15 {dimension_numbers = #tpu.dot_dimension_numbers<[1], [0], [0], [1], [0, 0, 1, 1], [], []>} : vector<2x64xbf16>, vector<64x128xbf16>, vector<2x128xf32> -> vector<2x128xf32>
    %41 = arith.addf %35, %40 : vector<2x128xf32>
    %42 = vector.extract_strided_slice %24 {offsets = [6, 0], sizes = [2, 64], strides = [1, 1]} : vector<8x64xf32> to vector<2x64xf32>
    %43 = arith.truncf %42 : vector<2x64xf32> to vector<2x64xbf16>
    %c3 = arith.constant 3 : index
    %c0_16 = arith.constant 0 : index
    %c0_17 = arith.constant 0 : index
    %44 = vector.load %arg4[%c3, %c0_16, %c0_17] : memref<4x64x128xbf16, #tpu.memory_space<vmem>>, vector<1x64x128xbf16>
    %45 = vector.shape_cast %44 : vector<1x64x128xbf16> to vector<64x128xbf16>
    %cst_18 = arith.constant dense<0.000000e+00> : vector<2x128xf32>
    %46 = tpu.matmul %43, %45, %cst_18 {dimension_numbers = #tpu.dot_dimension_numbers<[1], [0], [0], [1], [0, 0, 1, 1], [], []>} : vector<2x64xbf16>, vector<64x128xbf16>, vector<2x128xf32> -> vector<2x128xf32>
    %47 = arith.addf %41, %46 : vector<2x128xf32>
    %c0_19 = arith.constant 0 : index
    %c0_20 = arith.constant 0 : index
    %48 = vector.load %arg5[%c0_19, %c0_20] : memref<1x128xf32, #tpu.memory_space<vmem>>, vector<1x128xf32>
    %49 = vector.broadcast %48 : vector<1x128xf32> to vector<2x128xf32>
    %50 = arith.addf %47, %49 : vector<2x128xf32>
    %cst_21 = arith.constant 0.000000e+00 : f32
    %51 = vector.broadcast %cst_21 : f32 to vector<2x128xf32>
    %52 = arith.maximumf %50, %51 : vector<2x128xf32>
    %53 = arith.truncf %52 : vector<2x128xf32> to vector<2x128xbf16>
    %c0_22 = arith.constant 0 : index
    %c0_23 = arith.constant 0 : index
    %54 = vector.load %arg6[%c0_22, %c0_23] : memref<128x64xbf16, #tpu.memory_space<vmem>>, vector<128x64xbf16>
    %cst_24 = arith.constant dense<0.000000e+00> : vector<2x64xf32>
    %55 = tpu.matmul %53, %54, %cst_24 {dimension_numbers = #tpu.dot_dimension_numbers<[1], [0], [0], [1], [0, 0, 1, 1], [], []>} : vector<2x128xbf16>, vector<128x64xbf16>, vector<2x64xf32> -> vector<2x64xf32>
    %c0_25 = arith.constant 0 : index
    %c0_26 = arith.constant 0 : index
    %56 = vector.load %arg7[%c0_25, %c0_26] : memref<1x64xf32, #tpu.memory_space<vmem>>, vector<1x64xf32>
    %57 = vector.broadcast %56 : vector<1x64xf32> to vector<2x64xf32>
    %58 = arith.addf %55, %57 : vector<2x64xf32>
    %cst_27 = arith.constant 0.000000e+00 : f32
    %59 = vector.broadcast %cst_27 : f32 to vector<2x64xf32>
    %60 = arith.maximumf %58, %59 : vector<2x64xf32>
    %61 = arith.truncf %60 : vector<2x64xf32> to vector<2x64xbf16>
    %c0_28 = arith.constant 0 : index
    %c0_29 = arith.constant 0 : index
    %62 = vector.load %arg8[%c0_28, %c0_29] : memref<64x30xbf16, #tpu.memory_space<vmem>>, vector<64x30xbf16>
    %cst_30 = arith.constant dense<0.000000e+00> : vector<2x30xf32>
    %63 = tpu.matmul %61, %62, %cst_30 {dimension_numbers = #tpu.dot_dimension_numbers<[1], [0], [0], [1], [0, 0, 1, 1], [], []>} : vector<2x64xbf16>, vector<64x30xbf16>, vector<2x30xf32> -> vector<2x30xf32>
    %c0_31 = arith.constant 0 : index
    %c0_32 = arith.constant 0 : index
    %64 = vector.load %arg9[%c0_31, %c0_32] : memref<1x30xf32, #tpu.memory_space<vmem>>, vector<1x30xf32>
    %65 = vector.broadcast %64 : vector<1x30xf32> to vector<2x30xf32>
    %66 = arith.addf %63, %65 : vector<2x30xf32>
    %c0_33 = arith.constant 0 : index
    %c0_34 = arith.constant 0 : index
    %67 = vector.load %arg10[%c0_33, %c0_34] : memref<2x30xf32, #tpu.memory_space<vmem>>, vector<2x30xf32>
    tpu.vector_store %arg10[%c0_33, %c0_34], %66 {strides = array<i32>} : memref<2x30xf32, #tpu.memory_space<vmem>>, vector<2x30xf32>,
    return
  }
  func.func @transform_0(%arg0: i32) -> (i32, i32) {
    %c0_i32 = arith.constant 0 : i32
    %c0_i32_0 = arith.constant 0 : i32
    %c0_i32_1 = arith.constant 0 : i32
    return %c0_i32, %c0_i32_0 : i32, i32
  }
  func.func @transform_1(%arg0: i32) -> (i32, i32) {
    %c0_i32 = arith.constant 0 : i32
    %c0_i32_0 = arith.constant 0 : i32
    %c0_i32_1 = arith.constant 0 : i32
    return %c0_i32, %c0_i32_0 : i32, i32
  }
  func.func @transform_2(%arg0: i32) -> (i32, i32) {
    %c0_i32 = arith.constant 0 : i32
    %c0_i32_0 = arith.constant 0 : i32
    %c0_i32_1 = arith.constant 0 : i32
    return %c0_i32, %c0_i32_0 : i32, i32
  }
  func.func @transform_3(%arg0: i32) -> (i32, i32, i32) {
    %c0_i32 = arith.constant 0 : i32
    %c0_i32_0 = arith.constant 0 : i32
    %c0_i32_1 = arith.constant 0 : i32
    %c0_i32_2 = arith.constant 0 : i32
    return %c0_i32, %c0_i32_0, %c0_i32_1 : i32, i32, i32
  }
  func.func @transform_4(%arg0: i32) -> (i32, i32) {
    %c0_i32 = arith.constant 0 : i32
    %c0_i32_0 = arith.constant 0 : i32
    %c0_i32_1 = arith.constant 0 : i32
    return %c0_i32, %c0_i32_0 : i32, i32
  }
  func.func @transform_5(%arg0: i32) -> (i32, i32) {
    %c0_i32 = arith.constant 0 : i32
    %c0_i32_0 = arith.constant 0 : i32
    %c0_i32_1 = arith.constant 0 : i32
    return %c0_i32, %c0_i32_0 : i32, i32
  }
  func.func @transform_6(%arg0: i32) -> (i32, i32) {
    %c0_i32 = arith.constant 0 : i32
    %c0_i32_0 = arith.constant 0 : i32
    %c0_i32_1 = arith.constant 0 : i32
    return %c0_i32, %c0_i32_0 : i32, i32
  }
  func.func @transform_7(%arg0: i32) -> (i32, i32) {
    %c0_i32 = arith.constant 0 : i32
    %c0_i32_0 = arith.constant 0 : i32
    %c0_i32_1 = arith.constant 0 : i32
    return %c0_i32, %c0_i32_0 : i32, i32
  }
  func.func @transform_8(%arg0: i32) -> (i32, i32) {
    %c0_i32 = arith.constant 0 : i32
    %c0_i32_0 = arith.constant 0 : i32
    %c0_i32_1 = arith.constant 0 : i32
    return %c0_i32, %c0_i32_0 : i32, i32
  }
  func.func @transform_9(%arg0: i32) -> (i32, i32) {
    %c0_i32 = arith.constant 0 : i32
    %c0_i32_0 = arith.constant 0 : i32
    %c0_i32_1 = arith.constant 0 : i32
    return %c0_i32, %c0_i32_0 : i32, i32
  }
}

</mosaic_0001>

<bundles_post_ra>
// kernel: keypoint_model_forward.3
= control target key start
LH: loop header
LB: loop body
LE: loop exit
PB: predicated region body
PF: predicated region fallthrough
CT: control target
= control target key end

     0   :  { %s2623_s12 = smov 0   ;;  %s3033_s0 = inlined_call_operand.vmem [shape: bf16[2,16,9216], index: 0, kind: input, shape index: {}]   ;;  %s3034_s1 = inlined_call_operand.vmem [shape: bf16[16,16], index: 1, kind: input, shape index: {}]   ;;  %s3035_s2 = inlined_call_operand.vmem [shape: f32[16,1], index: 2, kind: input, shape index: {}]   ;;  %s3036_s3 = inlined_call_operand.vmem [shape: bf16[2,16,1024], index: 3, kind: output, shape index: {}]  }
   0x1 LB: > { %s2446_s13 = sadd.s32 4294967295, %s2600_s12   ;;  %p2450_p0 = scmp.ge.s32.totalorder %s2600_s12, 1  ;;  %s2600_s12 = sphi %s2623_s12, %s13_s12  }
   0x2   : > { %p137_p1 = scmp.lt.s32.totalorder %s2600_s12, 3 }
   0x4   : > { %p138_p2 = pnand %p2450_p0, %p137_p1 }
   0x5   : > { %p161_p3 = scmp.lt.s32.totalorder (!%p138_p2), %s2446_s13, 1  ;;  %v2602_v0 = vmov (!%p138_p2), 0   ;;  %v2653_v14 = vld [vmem:[%s3034_s1] sm:$0xff] (!%p138_p2)   ;;  %vm611_vm0 = vcmask (!%p138_p2), 130048  }
   0x6   : > { %141 = sbr.rel (%p138_p2) target bundleno = 386 (0x182), region = 32  ;;  %647 = vmatprep.mubr.bf16.mxu0 (!%p138_p2), %v2602_v0  ;;  %690 = vmatprep.mubr.bf16.mxu1 (!%p138_p2), %v2602_v0 }
   0x7   : > { %2592 = vset.pattern.permute.xlu0 (!%p138_p2), %v2602_v0 }
   0xd   : > { %s3038_s13 = smov (!%p161_p3, %s2446_s13), 1 }
   0xe   : > { %s2582_s14 = smul.u32 576, %s3038_s13  ;;  %s2573_s24 = sshll.u32 %s3038_s13, 6 }
   0xf   : > { %s3008_s27 = scalar_lea.vmem %s3036_s3, %s2573_s24 }
  0x10   : > { %s2640_s17 = scalar_lea.vmem %s3033_s0, %s2582_s14 }
  0x11   : > { %v174_v1 = vld [vmem:[%s2640_s17] sm:$0xff]  ;;  %v175_v3 = vld [vmem:[%s2640_s17 + $0x8] sm:$0xff]  ;;  %v176_v7 = vld [vmem:[%s2640_s17 + $0x10] sm:$0xff] }
  0x12   : > { %v210_v2 = vld [vmem:[%s2640_s17 + $0x120] sm:$0xff]  ;;  %v211_v5 = vld [vmem:[%s2640_s17 + $0x128] sm:$0xff]  ;;  %v212_v8 = vld [vmem:[%s2640_s17 + $0x130] sm:$0xff] }
  0x13   : > { %v2456_v4 = vcombine.high %v174_v1, %v210_v2  ;;  %v2455_v6 = vcombine.low %v174_v1, %v210_v2  ;;  %v2458_v9 = vcombine.high %v175_v3, %v211_v5  ;;  %v2457_v10 = vcombine.low %v175_v3, %v211_v5  ;;  %v177_v12 = vld [vmem:[%s2640_s17 + $0x18] sm:$0xff]  ;;  %v178_v16 = vld [vmem:[%s2640_s17 + $0x20] sm:$0xff]  ;;  %v179_v19 = vld [vmem:[%s2640_s17 + $0x28] sm:$0xff] }
  0x14   : > { %v2460_v11 = vcombine.high %v176_v7, %v212_v8  ;;  %v213_v13 = vld [vmem:[%s2640_s17 + $0x138] sm:$0xff]  ;;  %v214_v17 = vld [vmem:[%s2640_s17 + $0x140] sm:$0xff]  ;;  %v2459_v18 = vcombine.low %v176_v7, %v212_v8  ;;  %v215_v20 = vld [vmem:[%s2640_s17 + $0x148] sm:$0xff] }
  0x15   : > { %615 = vmatprep.subr.bf16.mxu0 %v2456_v4  ;;  %v2462_v15 = vcombine.high %v177_v12, %v213_v13  ;;  %658 = vmatprep.subr.bf16.mxu1 %v2458_v9  ;;  %v2461_v21 = vcombine.low %v177_v12, %v213_v13  ;;  %v2464_v22 = vcombine.high %v178_v16, %v214_v17  ;;  %v180_v24 = vld [vmem:[%s2640_s17 + $0x30] sm:$0xff]  ;;  %v181_v27 = vld [vmem:[%s2640_s17 + $0x38] sm:$0xff]  ;;  %v182_v32 = vld [vmem:[%s2640_s17 + $0x40] sm:$0xff] }
  0x16   : > { %616 = vmatpush1.bf16.msra.mxu0 %v2455_v6  ;;  %659 = vmatpush1.bf16.msra.mxu1 %v2457_v10  ;;  %v2466_v23 = vcombine.high %v179_v19, %v215_v20  ;;  %v216_v25 = vld [vmem:[%s2640_s17 + $0x150] sm:$0xff]  ;;  %v2463_v26 = vcombine.low %v178_v16, %v214_v17  ;;  %v217_v28 = vld [vmem:[%s2640_s17 + $0x158] sm:$0xff]  ;;  %v2465_v29 = vcombine.low %v179_v19, %v215_v20  ;;  %v218_v33 = vld [vmem:[%s2640_s17 + $0x160] sm:$0xff] }
  0x17   : > { %701 = vmatprep.subr.bf16.mxu0 %v2460_v11  ;;  %744 = vmatprep.subr.bf16.mxu1 %v2462_v15  ;;  %v2468_v30 = vcombine.high %v180_v24, %v216_v25  ;;  %v2470_v31 = vcombine.high %v181_v27, %v217_v28  ;;  %v2467_v34 = vcombine.low %v180_v24, %v216_v25  ;;  %v183_v35 = vld [vmem:[%s2640_s17 + $0x48] sm:$0xff]  ;;  %v184_v40 = vld [vmem:[%s2640_s17 + $0x50] sm:$0xff]  ;;  %v185_v43 = vld [vmem:[%s2640_s17 + $0x58] sm:$0xff] }
  0x18   : > { %v219_v36 = vld [vmem:[%s2640_s17 + $0x168] sm:$0xff]  ;;  %v2469_v37 = vcombine.low %v181_v27, %v217_v28  ;;  %v2472_v38 = vcombine.high %v182_v32, %v218_v33  ;;  %v220_v41 = vld [vmem:[%s2640_s17 + $0x170] sm:$0xff]  ;;  %v2471_v42 = vcombine.low %v182_v32, %v218_v33  ;;  %v221_v44 = vld [vmem:[%s2640_s17 + $0x178] sm:$0xff] }
  0x19   : > { %2527 = vmatmul.mubr.msk.bf16.vlgmr.msra.gmra.mrb[0].mxu0 %vm611_vm0, %v2653_v14  ;;  %2528 = vmatmul.mubr.msk.bf16.vlgmr.msra.gmra.mrb[0].mxu1 %vm611_vm0, %v2653_v14  ;;  %v2474_v39 = vcombine.high %v183_v35, %v219_v36  ;;  %v2473_v45 = vcombine.low %v183_v35, %v219_v36  ;;  %v2476_v46 = vcombine.high %v184_v40, %v220_v41  ;;  %v186_v48 = vld [vmem:[%s2640_s17 + $0x60] sm:$0xff]  ;;  %v187_v51 = vld [vmem:[%s2640_s17 + $0x68] sm:$0xff]  ;;  %v188_v56 = vld [vmem:[%s2640_s17 + $0x70] sm:$0xff] }
  0x1a   : > { %702 = vmatpush1.bf16.msra.mxu0 %v2459_v18  ;;  %745 = vmatpush1.bf16.msra.mxu1 %v2461_v21  ;;  %v2478_v47 = vcombine.high %v185_v43, %v221_v44  ;;  %v222_v49 = vld [vmem:[%s2640_s17 + $0x180] sm:$0xff]  ;;  %v2475_v50 = vcombine.low %v184_v40, %v220_v41  ;;  %v223_v52 = vld [vmem:[%s2640_s17 + $0x188] sm:$0xff]  ;;  %v2477_v53 = vcombine.low %v185_v43, %v221_v44  ;;  %v224_v57 = vld [vmem:[%s2640_s17 + $0x190] sm:$0xff] }
  0x1b   : > { %733 = vmatprep.mubr.bf16.mxu0 %v2602_v0  ;;  %776 = vmatprep.mubr.bf16.mxu1 %v2602_v0  ;;  %v2480_v54 = vcombine.high %v186_v48, %v222_v49  ;;  %v2482_v55 = vcombine.high %v187_v51, %v223_v52  ;;  %v2479_v58 = vcombine.low %v186_v48, %v222_v49  ;;  %v189_v59 = vld [vmem:[%s2640_s17 + $0x78] sm:$0xff]  ;;  %v190_v1 = vld [vmem:[%s2640_s17 + $0x80] sm:$0xff]  ;;  %v191_v4 = vld [vmem:[%s2640_s17 + $0x88] sm:$0xff] }
  0x1c   : > { %787 = vmatprep.subr.bf16.mxu0 %v2464_v22  ;;  %830 = vmatprep.subr.bf16.mxu1 %v2466_v23  ;;  %v225_v60 = vld [vmem:[%s2640_s17 + $0x198] sm:$0xff]  ;;  %v2481_v61 = vcombine.low %v187_v51, %v223_v52  ;;  %v2484_v62 = vcombine.high %v188_v56, %v224_v57  ;;  %v226_v2 = vld [vmem:[%s2640_s17 + $0x1a0] sm:$0xff]  ;;  %v2483_v3 = vcombine.low %v188_v56, %v224_v57  ;;  %v227_v5 = vld [vmem:[%s2640_s17 + $0x1a8] sm:$0xff] }
  0x1d   : > { %v2486_v63 = vcombine.high %v189_v59, %v225_v60  ;;  %v2485_v6 = vcombine.low %v189_v59, %v225_v60  ;;  %v2488_v7 = vcombine.high %v190_v1, %v226_v2  ;;  %v2490_v8 = vcombine.high %v191_v4, %v227_v5  ;;  %v192_v9 = vld [vmem:[%s2640_s17 + $0x90] sm:$0xff]  ;;  %v193_v12 = vld [vmem:[%s2640_s17 + $0x98] sm:$0xff]  ;;  %v194_v18 = vld [vmem:[%s2640_s17 + $0xa0] sm:$0xff] }
  0x1e   : > { %v228_v10 = vld [vmem:[%s2640_s17 + $0x1b0] sm:$0xff]  ;;  %v2487_v11 = vcombine.low %v190_v1, %v226_v2  ;;  %v229_v13 = vld [vmem:[%s2640_s17 + $0x1b8] sm:$0xff]  ;;  %v2489_v15 = vcombine.low %v191_v4, %v227_v5  ;;  %v230_v19 = vld [vmem:[%s2640_s17 + $0x1c0] sm:$0xff] }
  0x1f   : > { %v2492_v16 = vcombine.high %v192_v9, %v228_v10  ;;  %v2494_v17 = vcombine.high %v193_v12, %v229_v13  ;;  %v2491_v20 = vcombine.low %v192_v9, %v228_v10  ;;  %v195_v21 = vld [vmem:[%s2640_s17 + $0xa8] sm:$0xff]  ;;  %v2493_v23 = vcombine.low %v193_v12, %v229_v13  ;;  %v232_v27 = vld [vmem:[%s2640_s17 + $0x1d0] sm:$0xff]  ;;  %v234_v35 = vld [vmem:[%s2640_s17 + $0x1e0] sm:$0xff] }
  0x20   : > { %v231_v22 = vld [vmem:[%s2640_s17 + $0x1c8] sm:$0xff]  ;;  %v2496_v24 = vcombine.high %v194_v18, %v230_v19  ;;  %v2495_v28 = vcombine.low %v194_v18, %v230_v19  ;;  %v236_v43 = vld [vmem:[%s2640_s17 + $0x1f0] sm:$0xff]  ;;  %v2291_v44 = vld [vmem:[%s3035_s2] sm:$0xff] }
  0x21   : > { %2529 = vmatmul.mubr.msk.bf16.vlgmr.msra.gmra.mrb[4].mxu0 %vm611_vm0, %v2653_v14  ;;  %2530 = vmatmul.mubr.msk.bf16.vlgmr.msra.gmra.mrb[4].mxu1 %vm611_vm0, %v2653_v14  ;;  %v2498_v25 = vcombine.high %v195_v21, %v231_v22  ;;  %v2292_v51 = vld [vmem:[%s3035_s2 + $0x8] sm:$0xff]  ;;  %v202_v52 = vld [vmem:[%s2640_s17 + $0xe0] sm:$0xff]  ;;  %v204_v60 = vld [vmem:[%s2640_s17 + $0xf0] sm:$0xff] }
  0x22   : > { %788 = vmatpush1.bf16.msra.mxu0 %v2463_v26  ;;  %831 = vmatpush1.bf16.msra.mxu1 %v2465_v29  ;;  %v196_v26 = vld [vmem:[%s2640_s17 + $0xb0] sm:$0xff]  ;;  %v197_v29 = vld [vmem:[%s2640_s17 + $0xb8] sm:$0xff]  ;;  %v239_v56 = vld [vmem:[%s2640_s17 + $0x208] sm:$0xff] }
  0x23   : > { %819 = vmatprep.mubr.bf16.mxu0 %v2602_v0  ;;  %862 = vmatprep.mubr.bf16.mxu1 %v2602_v0  ;;  %v2500_v32 = vcombine.high %v196_v26, %v232_v27  ;;  %v2499_v36 = vcombine.low %v196_v26, %v232_v27  ;;  %v241_v1 = vld [vmem:[%s2640_s17 + $0x218] sm:$0xff]  ;;  %v206_v5 = vld [vmem:[%s2640_s17 + $0x100] sm:$0xff]  ;;  %v243_v9 = vld [vmem:[%s2640_s17 + $0x228] sm:$0xff] }
  0x24   : > { %873 = vmatprep.subr.bf16.mxu0 %v2468_v30  ;;  %916 = vmatprep.subr.bf16.mxu1 %v2470_v31  ;;  %v233_v30 = vld [vmem:[%s2640_s17 + $0x1d8] sm:$0xff]  ;;  %v2497_v31 = vcombine.low %v195_v21, %v231_v22  ;;  %v208_v13 = vld [vmem:[%s2640_s17 + $0x110] sm:$0xff] }
  0x25   : > { %v2502_v33 = vcombine.high %v197_v29, %v233_v30  ;;  %2295 = vperm.xlu0 %2592, %v2291_v44   ;;  %v245_v18 = vld [vmem:[%s2640_s17 + $0x238] sm:$0xff] }
  0x29   : > { %2531 = vmatmul.mubr.msk.bf16.vlgmr.msra.gmra.mrb[8].mxu0 %vm611_vm0, %v2653_v14  ;;  %2532 = vmatmul.mubr.msk.bf16.vlgmr.msra.gmra.mrb[8].mxu1 %vm611_vm0, %v2653_v14 }
  0x2a   : > { %874 = vmatpush1.bf16.msra.mxu0 %v2467_v34  ;;  %917 = vmatpush1.bf16.msra.mxu1 %v2469_v37  ;;  %v198_v34 = vld [vmem:[%s2640_s17 + $0xc0] sm:$0xff]  ;;  %v199_v37 = vld [vmem:[%s2640_s17 + $0xc8] sm:$0xff] }
  0x2b   : > { %905 = vmatprep.mubr.bf16.mxu0 %v2602_v0  ;;  %948 = vmatprep.mubr.bf16.mxu1 %v2602_v0  ;;  %v2504_v40 = vcombine.high %v198_v34, %v234_v35 }
  0x2c   : > { %959 = vmatprep.subr.bf16.mxu0 %v2472_v38  ;;  %1002 = vmatprep.subr.bf16.mxu1 %v2474_v39  ;;  %v235_v38 = vld [vmem:[%s2640_s17 + $0x1e8] sm:$0xff]  ;;  %v2501_v39 = vcombine.low %v197_v29, %v233_v30 }
  0x2d   : > { %v2506_v41 = vcombine.high %v199_v37, %v235_v38  ;;  %v2505_v48 = vcombine.low %v199_v37, %v235_v38  ;;  %2300 = vperm.xlu0 %2592, %v2292_v51  }
  0x31   : > { %2533 = vmatmul.mubr.msk.bf16.vlgmr.msra.gmra.mrb[12].mxu0 %vm611_vm0, %v2653_v14  ;;  %2534 = vmatmul.mubr.msk.bf16.vlgmr.msra.gmra.mrb[12].mxu1 %vm611_vm0, %v2653_v14 }
  0x32   : > { %960 = vmatpush1.bf16.msra.mxu0 %v2471_v42  ;;  %1003 = vmatpush1.bf16.msra.mxu1 %v2473_v45  ;;  %v200_v42 = vld [vmem:[%s2640_s17 + $0xd0] sm:$0xff]  ;;  %v2503_v45 = vcombine.low %v198_v34, %v234_v35 }
  0x33   : > { %991 = vmatprep.mubr.bf16.mxu0 %v2602_v0  ;;  %1034 = vmatprep.mubr.bf16.mxu1 %v2602_v0  ;;  %v2508_v49 = vcombine.high %v200_v42, %v236_v43 }
  0x34   : > { %1045 = vmatprep.subr.bf16.mxu0 %v2476_v46  ;;  %1088 = vmatprep.subr.bf16.mxu1 %v2478_v47  ;;  %v201_v46 = vld [vmem:[%s2640_s17 + $0xd8] sm:$0xff] }
  0x35   : > { %v237_v47 = vld [vmem:[%s2640_s17 + $0x1f8] sm:$0xff] }
  0x36   : > { %v2509_v57 = vcombine.low %v201_v46, %v237_v47 }
  0x39   : > { %2535 = vmatmul.mubr.msk.bf16.vlgmr.msra.gmra.mrb[16].mxu0 %vm611_vm0, %v2653_v14  ;;  %2536 = vmatmul.mubr.msk.bf16.vlgmr.msra.gmra.mrb[16].mxu1 %vm611_vm0, %v2653_v14 }
  0x3a   : > { %1046 = vmatpush1.bf16.msra.mxu0 %v2475_v50  ;;  %1089 = vmatpush1.bf16.msra.mxu1 %v2477_v53  ;;  %v2510_v50 = vcombine.high %v201_v46, %v237_v47  ;;  %v238_v53 = vld [vmem:[%s2640_s17 + $0x200] sm:$0xff] }
  0x3b   : > { %1077 = vmatprep.mubr.bf16.mxu0 %v2602_v0  ;;  %1120 = vmatprep.mubr.bf16.mxu1 %v2602_v0 }
  0x3c   : > { %1131 = vmatprep.subr.bf16.mxu0 %v2480_v54  ;;  %1174 = vmatprep.subr.bf16.mxu1 %v2482_v55  ;;  %v2507_v54 = vcombine.low %v200_v42, %v236_v43  ;;  %v203_v55 = vld [vmem:[%s2640_s17 + $0xe8] sm:$0xff] }
  0x3d   : > { %v2514_v59 = vcombine.high %v203_v55, %v239_v56  ;;  %v2513_v2 = vcombine.low %v203_v55, %v239_v56 }
  0x41   : > { %2537 = vmatmul.mubr.msk.bf16.vlgmr.msra.gmra.mrb[20].mxu0 %vm611_vm0, %v2653_v14  ;;  %2538 = vmatmul.mubr.msk.bf16.vlgmr.msra.gmra.mrb[20].mxu1 %vm611_vm0, %v2653_v14 }
  0x42   : > { %1132 = vmatpush1.bf16.msra.mxu0 %v2479_v58  ;;  %1175 = vmatpush1.bf16.msra.mxu1 %v2481_v61  ;;  %v2512_v58 = vcombine.high %v202_v52, %v238_v53  ;;  %v240_v61 = vld [vmem:[%s2640_s17 + $0x210] sm:$0xff] }
  0x43   : > { %1163 = vmatprep.mubr.bf16.mxu0 %v2602_v0  ;;  %1206 = vmatprep.mubr.bf16.mxu1 %v2602_v0 }
  0x44   : > { %1217 = vmatprep.subr.bf16.mxu0 %v2484_v62  ;;  %1260 = vmatprep.subr.bf16.mxu1 %v2486_v63  ;;  %v2511_v62 = vcombine.low %v202_v52, %v238_v53  ;;  %v205_v63 = vld [vmem:[%s2640_s17 + $0xf8] sm:$0xff] }
  0x45   : > { %v2518_v4 = vcombine.high %v205_v63, %v241_v1  ;;  %v2517_v10 = vcombine.low %v205_v63, %v241_v1 }
  0x49   : > { %2539 = vmatmul.mubr.msk.bf16.vlgmr.msra.gmra.mrb[24].mxu0 %vm611_vm0, %v2653_v14  ;;  %2540 = vmatmul.mubr.msk.bf16.vlgmr.msra.gmra.mrb[24].mxu1 %vm611_vm0, %v2653_v14 }
  0x4a   : > { %1218 = vmatpush1.bf16.msra.mxu0 %v2483_v3  ;;  %1261 = vmatpush1.bf16.msra.mxu1 %v2485_v6  ;;  %v2516_v3 = vcombine.high %v204_v60, %v240_v61  ;;  %v242_v6 = vld [vmem:[%s2640_s17 + $0x220] sm:$0xff] }
  0x4b   : > { %1249 = vmatprep.mubr.bf16.mxu0 %v2602_v0  ;;  %1292 = vmatprep.mubr.bf16.mxu1 %v2602_v0 }
  0x4c   : > { %1303 = vmatprep.subr.bf16.mxu0 %v2488_v7  ;;  %1346 = vmatprep.subr.bf16.mxu1 %v2490_v8  ;;  %v2515_v7 = vcombine.low %v204_v60, %v240_v61  ;;  %v207_v8 = vld [vmem:[%s2640_s17 + $0x108] sm:$0xff] }
  0x4d   : > { %v2522_v12 = vcombine.high %v207_v8, %v243_v9  ;;  %v2521_v19 = vcombine.low %v207_v8, %v243_v9 }
  0x51   : > { %2541 = vmatmul.mubr.msk.bf16.vlgmr.msra.gmra.mrb[28].mxu0 %vm611_vm0, %v2653_v14  ;;  %2542 = vmatmul.mubr.msk.bf16.vlgmr.msra.gmra.mrb[28].mxu1 %vm611_vm0, %v2653_v14 }
  0x52   : > { %1304 = vmatpush1.bf16.msra.mxu0 %v2487_v11  ;;  %1347 = vmatpush1.bf16.msra.mxu1 %v2489_v15  ;;  %v2520_v11 = vcombine.high %v206_v5, %v242_v6  ;;  %v244_v15 = vld [vmem:[%s2640_s17 + $0x230] sm:$0xff] }
  0x53   : > { %1335 = vmatprep.mubr.bf16.mxu0 %v2602_v0  ;;  %1378 = vmatprep.mubr.bf16.mxu1 %v2602_v0  ;;  %v2523_v22 = vcombine.low %v208_v13, %v244_v15 }
  0x54   : > { %1389 = vmatprep.subr.bf16.mxu0 %v2492_v16  ;;  %1432 = vmatprep.subr.bf16.mxu1 %v2494_v17  ;;  %v2519_v16 = vcombine.low %v206_v5, %v242_v6  ;;  %v209_v17 = vld [vmem:[%s2640_s17 + $0x118] sm:$0xff] }
  0x55   : > { %v2526_v21 = vcombine.high %v209_v17, %v245_v18 }
  0x59   : > { %2543 = vmatmul.mubr.msk.bf16.vlgmr.msra.gmra.mrb[32].mxu0 %vm611_vm0, %v2653_v14  ;;  %2544 = vmatmul.mubr.msk.bf16.vlgmr.msra.gmra.mrb[32].mxu1 %vm611_vm0, %v2653_v14 }
  0x5a   : > { %1390 = vmatpush1.bf16.msra.mxu0 %v2491_v20  ;;  %1433 = vmatpush1.bf16.msra.mxu1 %v2493_v23  ;;  %v2524_v20 = vcombine.high %v208_v13, %v244_v15  ;;  %v2525_v23 = vcombine.low %v209_v17, %v245_v18 }
  0x5b   : > { %1421 = vmatprep.mubr.bf16.mxu0 %v2602_v0  ;;  %1464 = vmatprep.mubr.bf16.mxu1 %v2602_v0 }
  0x5c   : > { %1475 = vmatprep.subr.bf16.mxu0 %v2496_v24  ;;  %1518 = vmatprep.subr.bf16.mxu1 %v2498_v25 }
  0x61   : > { %2545 = vmatmul.mubr.msk.bf16.vlgmr.msra.gmra.mrb[36].mxu0 %vm611_vm0, %v2653_v14  ;;  %2546 = vmatmul.mubr.msk.bf16.vlgmr.msra.gmra.mrb[36].mxu1 %vm611_vm0, %v2653_v14 }
  0x62   : > { %1476 = vmatpush1.bf16.msra.mxu0 %v2495_v28  ;;  %1519 = vmatpush1.bf16.msra.mxu1 %v2497_v31 }
  0x63   : > { %1507 = vmatprep.mubr.bf16.mxu0 %v2602_v0  ;;  %1550 = vmatprep.mubr.bf16.mxu1 %v2602_v0 }
  0x64   : > { %1561 = vmatprep.subr.bf16.mxu0 %v2500_v32  ;;  %1604 = vmatprep.subr.bf16.mxu1 %v2502_v33 }
  0x69   : > { %2547 = vmatmul.mubr.msk.bf16.vlgmr.msra.gmra.mrb[40].mxu0 %vm611_vm0, %v2653_v14  ;;  %2548 = vmatmul.mubr.msk.bf16.vlgmr.msra.gmra.mrb[40].mxu1 %vm611_vm0, %v2653_v14 }
  0x6a   : > { %1562 = vmatpush1.bf16.msra.mxu0 %v2499_v36  ;;  %1605 = vmatpush1.bf16.msra.mxu1 %v2501_v39 }
  0x6b   : > { %1593 = vmatprep.mubr.bf16.mxu0 %v2602_v0  ;;  %1636 = vmatprep.mubr.bf16.mxu1 %v2602_v0 }
  0x6c   : > { %1647 = vmatprep.subr.bf16.mxu0 %v2504_v40  ;;  %1690 = vmatprep.subr.bf16.mxu1 %v2506_v41 }
  0x71   : > { %2549 = vmatmul.mubr.msk.bf16.vlgmr.msra.gmra.mrb[44].mxu0 %vm611_vm0, %v2653_v14  ;;  %2550 = vmatmul.mubr.msk.bf16.vlgmr.msra.gmra.mrb[44].mxu1 %vm611_vm0, %v2653_v14 }
  0x72   : > { %1648 = vmatpush1.bf16.msra.mxu0 %v2503_v45  ;;  %1691 = vmatpush1.bf16.msra.mxu1 %v2505_v48 }
  0x73   : > { %1679 = vmatprep.mubr.bf16.mxu0 %v2602_v0  ;;  %1722 = vmatprep.mubr.bf16.mxu1 %v2602_v0 }
  0x74   : > { %1733 = vmatprep.subr.bf16.mxu0 %v2508_v49  ;;  %1776 = vmatprep.subr.bf16.mxu1 %v2510_v50 }
  0x79   : > { %2551 = vmatmul.mubr.msk.bf16.vlgmr.msra.gmra.mrb[48].mxu0 %vm611_vm0, %v2653_v14  ;;  %2552 = vmatmul.mubr.msk.bf16.vlgmr.msra.gmra.mrb[48].mxu1 %vm611_vm0, %v2653_v14 }
  0x7a   : > { %1734 = vmatpush1.bf16.msra.mxu0 %v2507_v54  ;;  %1777 = vmatpush1.bf16.msra.mxu1 %v2509_v57 }
  0x7b   : > { %1765 = vmatprep.mubr.bf16.mxu0 %v2602_v0  ;;  %1808 = vmatprep.mubr.bf16.mxu1 %v2602_v0 }
  0x7c   : > { %1819 = vmatprep.subr.bf16.mxu0 %v2512_v58  ;;  %1862 = vmatprep.subr.bf16.mxu1 %v2514_v59 }
  0x81   : > { %2553 = vmatmul.mubr.msk.bf16.vlgmr.msra.gmra.mrb[52].mxu0 %vm611_vm0, %v2653_v14  ;;  %2554 = vmatmul.mubr.msk.bf16.vlgmr.msra.gmra.mrb[52].mxu1 %vm611_vm0, %v2653_v14 }
  0x82   : > { %1820 = vmatpush1.bf16.msra.mxu0 %v2511_v62  ;;  %1863 = vmatpush1.bf16.msra.mxu1 %v2513_v2 }
  0x83   : > { %1851 = vmatprep.mubr.bf16.mxu0 %v2602_v0  ;;  %1894 = vmatprep.mubr.bf16.mxu1 %v2602_v0 }
  0x84   : > { %1905 = vmatprep.subr.bf16.mxu0 %v2516_v3  ;;  %1948 = vmatprep.subr.bf16.mxu1 %v2518_v4 }
  0x89   : > { %2555 = vmatmul.mubr.msk.bf16.vlgmr.msra.gmra.mrb[56].mxu0 %vm611_vm0, %v2653_v14  ;;  %2556 = vmatmul.mubr.msk.bf16.vlgmr.msra.gmra.mrb[56].mxu1 %vm611_vm0, %v2653_v14 }
  0x8a   : > { %1906 = vmatpush1.bf16.msra.mxu0 %v2515_v7  ;;  %1949 = vmatpush1.bf16.msra.mxu1 %v2517_v10 }
  0x8b   : > { %1937 = vmatprep.mubr.bf16.mxu0 %v2602_v0  ;;  %1980 = vmatprep.mubr.bf16.mxu1 %v2602_v0 }
  0x8c   : > { %1991 = vmatprep.subr.bf16.mxu0 %v2520_v11  ;;  %2034 = vmatprep.subr.bf16.mxu1 %v2522_v12 }
  0x91   : > { %2557 = vmatmul.mubr.msk.bf16.vlgmr.msra.gmra.mrb[60].mxu0 %vm611_vm0, %v2653_v14  ;;  %2558 = vmatmul.mubr.msk.bf16.vlgmr.msra.gmra.mrb[60].mxu1 %vm611_vm0, %v2653_v14 }
  0x92   : > { %1992 = vmatpush1.bf16.msra.mxu0 %v2519_v16  ;;  %2035 = vmatpush1.bf16.msra.mxu1 %v2521_v19 }
  0x93   : > { %2023 = vmatprep.mubr.bf16.mxu0 %v2602_v0  ;;  %2066 = vmatprep.mubr.bf16.mxu1 %v2602_v0 }
  0x94   : > { %2077 = vmatprep.subr.bf16.mxu0 %v2524_v20  ;;  %2120 = vmatprep.subr.bf16.mxu1 %v2526_v21 }
  0x99   : > { %2559 = vmatmul.mubr.msk.bf16.vlgmr.msra.gmra.mrb[64].mxu0 %vm611_vm0, %v2653_v14  ;;  %2560 = vmatmul.mubr.msk.bf16.vlgmr.msra.gmra.mrb[64].mxu1 %vm611_vm0, %v2653_v14 }
  0x9a   : > { %2078 = vmatpush1.bf16.msra.mxu0 %v2523_v22  ;;  %2121 = vmatpush1.bf16.msra.mxu1 %v2525_v23 }
  0x9b   : > { %2109 = vmatprep.mubr.bf16.mxu0 %v2602_v0  ;;  %2152 = vmatprep.mubr.bf16.mxu1 %v2602_v0 }
  0xa1   : > { %2561 = vmatmul.mubr.msk.bf16.vlgmr.msra.gmra.mrb[68].mxu0 %vm611_vm0, %v2653_v14  ;;  %2562 = vmatmul.mubr.msk.bf16.vlgmr.msra.gmra.mrb[68].mxu1 %vm611_vm0, %v2653_v14 }
  0xec   : > { %v649_v24 = vpop.f32.mrb[0].mxu0  ;;  %v692_v25 = vpop.f32.mrb[0].mxu1 }
  0xed   : > { %v651_v26 = vpop.f32.mrb[1].mxu0  ;;  %v694_v27 = vpop.f32.mrb[1].mxu1 }
  0xee   : > { %v653_v28 = vpop.f32.mrb[2].mxu0  ;;  %v696_v29 = vpop.f32.mrb[2].mxu1 }
  0xef   : > { %v655_v30 = vpop.f32.mrb[3].mxu0  ;;  %v698_v31 = vpop.f32.mrb[3].mxu1 }
  0xf4   : > { %v735_v32 = vpop.f32.mrb[4].mxu0  ;;  %v778_v33 = vpop.f32.mrb[4].mxu1 }
  0xf5   : > { %v737_v34 = vpop.f32.mrb[5].mxu0  ;;  %v780_v35 = vpop.f32.mrb[5].mxu1 }
  0xf6   : > { %v739_v36 = vpop.f32.mrb[6].mxu0  ;;  %v2831_v0 = vpop.f32.mrb[6].mxu1 }
  0xf7   : > { %v2833_v37 = vpop.f32.mrb[7].mxu0  ;;  %v2835_v38 = vpop.f32.mrb[7].mxu1 }
  0xfc   : > { %v821_v14 = vpop.f32.mrb[8].mxu0  ;;  %v864_v40 = vpop.f32.mrb[8].mxu1 }
  0xfd   : > { %v2163_v39 = vmax.f32 %v649_v24, %v821_v14  ;;  %v823_v41 = vpop.f32.mrb[9].mxu0  ;;  %v2165_v42 = vmax.f32 %v692_v25, %v864_v40  ;;  %v866_v44 = vpop.f32.mrb[9].mxu1 }
  0xfe   : > { %v2164_v43 = vmax.f32 %v651_v26, %v823_v41  ;;  %v825_v45 = vpop.f32.mrb[10].mxu0  ;;  %v2166_v46 = vmax.f32 %v694_v27, %v866_v44  ;;  %v868_v48 = vpop.f32.mrb[10].mxu1 }
  0xff   : > { %v2171_v47 = vmax.f32 %v653_v28, %v825_v45  ;;  %v827_v49 = vpop.f32.mrb[11].mxu0  ;;  %v2173_v50 = vmax.f32 %v696_v29, %v868_v48  ;;  %v870_v52 = vpop.f32.mrb[11].mxu1 }
 0x100   : > { %v2172_v51 = vmax.f32 %v655_v30, %v827_v49  ;;  %v2174_v53 = vmax.f32 %v698_v31, %v870_v52 }
 0x104   : > { %v907_v54 = vpop.f32.mrb[12].mxu0  ;;  %v950_v56 = vpop.f32.mrb[12].mxu1 }
 0x105   : > { %v2167_v55 = vmax.f32 %v735_v32, %v907_v54  ;;  %v909_v57 = vpop.f32.mrb[13].mxu0  ;;  %v2169_v58 = vmax.f32 %v778_v33, %v950_v56  ;;  %v952_v60 = vpop.f32.mrb[13].mxu1 }
 0x106   : > { %v2168_v59 = vmax.f32 %v737_v34, %v909_v57  ;;  %v911_v61 = vpop.f32.mrb[14].mxu0  ;;  %v2170_v62 = vmax.f32 %v780_v35, %v952_v60  ;;  %v954_v1 = vpop.f32.mrb[14].mxu1 }
 0x107   : > { %v2175_v63 = vmax.f32 %v739_v36, %v911_v61  ;;  %v913_v2 = vpop.f32.mrb[15].mxu0  ;;  %v2177_v3 = vmax.f32 %v2831_v0, %v954_v1  ;;  %v956_v5 = vpop.f32.mrb[15].mxu1 }
 0x108   : > { %v2176_v4 = vmax.f32 %v2833_v37, %v913_v2  ;;  %v2178_v6 = vmax.f32 %v2835_v38, %v956_v5 }
 0x10c   : > { %v993_v7 = vpop.f32.mrb[16].mxu0  ;;  %v1036_v9 = vpop.f32.mrb[16].mxu1 }
 0x10d   : > { %v2840_v8 = vmax.f32 %v2163_v39, %v993_v7  ;;  %v995_v10 = vpop.f32.mrb[17].mxu0  ;;  %v2842_v11 = vmax.f32 %v2165_v42, %v1036_v9  ;;  %v1038_v13 = vpop.f32.mrb[17].mxu1 }
 0x10e   : > { %v2844_v12 = vmax.f32 %v2164_v43, %v995_v10  ;;  %v997_v15 = vpop.f32.mrb[18].mxu0  ;;  %v2846_v16 = vmax.f32 %v2166_v46, %v1038_v13  ;;  %v1040_v18 = vpop.f32.mrb[18].mxu1 }
 0x10f   : > { %v2848_v17 = vmax.f32 %v2171_v47, %v997_v15  ;;  %v999_v19 = vpop.f32.mrb[19].mxu0  ;;  %v2850_v20 = vmax.f32 %v2173_v50, %v1040_v18  ;;  %v1042_v22 = vpop.f32.mrb[19].mxu1 }
 0x110   : > { %v2852_v21 = vmax.f32 %v2172_v51, %v999_v19  ;;  %v2854_v23 = vmax.f32 %v2174_v53, %v1042_v22 }
 0x114   : > { %v1079_v24 = vpop.f32.mrb[20].mxu0  ;;  %v1122_v26 = vpop.f32.mrb[20].mxu1 }
 0x115   : > { %v2856_v25 = vmax.f32 %v2167_v55, %v1079_v24  ;;  %v1081_v27 = vpop.f32.mrb[21].mxu0  ;;  %v2858_v28 = vmax.f32 %v2169_v58, %v1122_v26  ;;  %v1124_v30 = vpop.f32.mrb[21].mxu1 }
 0x116   : > { %v2860_v29 = vmax.f32 %v2168_v59, %v1081_v27  ;;  %v1083_v31 = vpop.f32.mrb[22].mxu0  ;;  %v2862_v32 = vmax.f32 %v2170_v62, %v1124_v30  ;;  %v1126_v34 = vpop.f32.mrb[22].mxu1 }
 0x117   : > { %v2864_v33 = vmax.f32 %v2175_v63, %v1083_v31  ;;  %v1085_v35 = vpop.f32.mrb[23].mxu0  ;;  %v2866_v36 = vmax.f32 %v2177_v3, %v1126_v34  ;;  %v1128_v37 = vpop.f32.mrb[23].mxu1 }
 0x118   : > { %v2868_v0 = vmax.f32 %v2176_v4, %v1085_v35  ;;  %v2870_v38 = vmax.f32 %v2178_v6, %v1128_v37 }
 0x11c   : > { %v1165_v14 = vpop.f32.mrb[24].mxu0  ;;  %v1208_v40 = vpop.f32.mrb[24].mxu1 }
 0x11d   : > { %v2195_v39 = vmax.f32 %v2840_v8, %v1165_v14  ;;  %v1167_v41 = vpop.f32.mrb[25].mxu0  ;;  %v2197_v42 = vmax.f32 %v2842_v11, %v1208_v40  ;;  %v1210_v44 = vpop.f32.mrb[25].mxu1 }
 0x11e   : > { %v2196_v43 = vmax.f32 %v2844_v12, %v1167_v41  ;;  %v1169_v45 = vpop.f32.mrb[26].mxu0  ;;  %v2198_v46 = vmax.f32 %v2846_v16, %v1210_v44  ;;  %v1212_v48 = vpop.f32.mrb[26].mxu1 }
 0x11f   : > { %v2203_v47 = vmax.f32 %v2848_v17, %v1169_v45  ;;  %v1171_v49 = vpop.f32.mrb[27].mxu0  ;;  %v2205_v50 = vmax.f32 %v2850_v20, %v1212_v48  ;;  %v1214_v52 = vpop.f32.mrb[27].mxu1 }
 0x120   : > { %v2204_v51 = vmax.f32 %v2852_v21, %v1171_v49  ;;  %v2206_v53 = vmax.f32 %v2854_v23, %v1214_v52 }
 0x124   : > { %v1251_v54 = vpop.f32.mrb[28].mxu0  ;;  %v1294_v56 = vpop.f32.mrb[28].mxu1 }
 0x125   : > { %v2199_v55 = vmax.f32 %v2856_v25, %v1251_v54  ;;  %v1253_v57 = vpop.f32.mrb[29].mxu0  ;;  %v2201_v58 = vmax.f32 %v2858_v28, %v1294_v56  ;;  %v1296_v60 = vpop.f32.mrb[29].mxu1 }
 0x126   : > { %v2200_v59 = vmax.f32 %v2860_v29, %v1253_v57  ;;  %v1255_v61 = vpop.f32.mrb[30].mxu0  ;;  %v2202_v62 = vmax.f32 %v2862_v32, %v1296_v60  ;;  %v1298_v1 = vpop.f32.mrb[30].mxu1 }
 0x127   : > { %v2207_v63 = vmax.f32 %v2864_v33, %v1255_v61  ;;  %v1257_v2 = vpop.f32.mrb[31].mxu0  ;;  %v2209_v3 = vmax.f32 %v2866_v36, %v1298_v1  ;;  %v1300_v5 = vpop.f32.mrb[31].mxu1 }
 0x128   : > { %v2208_v4 = vmax.f32 %v2868_v0, %v1257_v2  ;;  %v2210_v6 = vmax.f32 %v2870_v38, %v1300_v5 }
 0x12c   : > { %v1337_v7 = vpop.f32.mrb[32].mxu0  ;;  %v1380_v9 = vpop.f32.mrb[32].mxu1 }
 0x12d   : > { %v2888_v8 = vmax.f32 %v2195_v39, %v1337_v7  ;;  %v1339_v10 = vpop.f32.mrb[33].mxu0  ;;  %v2890_v11 = vmax.f32 %v2197_v42, %v1380_v9  ;;  %v1382_v13 = vpop.f32.mrb[33].mxu1 }
 0x12e   : > { %v2892_v12 = vmax.f32 %v2196_v43, %v1339_v10  ;;  %v1341_v15 = vpop.f32.mrb[34].mxu0  ;;  %v2894_v16 = vmax.f32 %v2198_v46, %v1382_v13  ;;  %v1384_v18 = vpop.f32.mrb[34].mxu1 }
 0x12f   : > { %v2896_v17 = vmax.f32 %v2203_v47, %v1341_v15  ;;  %v1343_v19 = vpop.f32.mrb[35].mxu0  ;;  %v2898_v20 = vmax.f32 %v2205_v50, %v1384_v18  ;;  %v1386_v22 = vpop.f32.mrb[35].mxu1 }
 0x130   : > { %v2900_v21 = vmax.f32 %v2204_v51, %v1343_v19  ;;  %v2902_v23 = vmax.f32 %v2206_v53, %v1386_v22 }
 0x134   : > { %v1423_v24 = vpop.f32.mrb[36].mxu0  ;;  %v1466_v26 = vpop.f32.mrb[36].mxu1 }
 0x135   : > { %v2904_v25 = vmax.f32 %v2199_v55, %v1423_v24  ;;  %v1425_v27 = vpop.f32.mrb[37].mxu0  ;;  %v2906_v28 = vmax.f32 %v2201_v58, %v1466_v26  ;;  %v1468_v30 = vpop.f32.mrb[37].mxu1 }
 0x136   : > { %v2908_v29 = vmax.f32 %v2200_v59, %v1425_v27  ;;  %v1427_v31 = vpop.f32.mrb[38].mxu0  ;;  %v2910_v32 = vmax.f32 %v2202_v62, %v1468_v30  ;;  %v1470_v34 = vpop.f32.mrb[38].mxu1 }
 0x137   : > { %v2912_v33 = vmax.f32 %v2207_v63, %v1427_v31  ;;  %v1429_v35 = vpop.f32.mrb[39].mxu0  ;;  %v2914_v36 = vmax.f32 %v2209_v3, %v1470_v34  ;;  %v1472_v37 = vpop.f32.mrb[39].mxu1 }
 0x138   : > { %v2916_v0 = vmax.f32 %v2208_v4, %v1429_v35  ;;  %v2918_v38 = vmax.f32 %v2210_v6, %v1472_v37 }
 0x13c   : > { %v1509_v14 = vpop.f32.mrb[40].mxu0  ;;  %v1552_v40 = vpop.f32.mrb[40].mxu1 }
 0x13d   : > { %v2227_v39 = vmax.f32 %v2888_v8, %v1509_v14  ;;  %v1511_v41 = vpop.f32.mrb[41].mxu0  ;;  %v2229_v42 = vmax.f32 %v2890_v11, %v1552_v40  ;;  %v1554_v44 = vpop.f32.mrb[41].mxu1 }
 0x13e   : > { %v2228_v43 = vmax.f32 %v2892_v12, %v1511_v41  ;;  %v1513_v45 = vpop.f32.mrb[42].mxu0  ;;  %v2230_v46 = vmax.f32 %v2894_v16, %v1554_v44  ;;  %v1556_v48 = vpop.f32.mrb[42].mxu1 }
 0x13f   : > { %v2235_v47 = vmax.f32 %v2896_v17, %v1513_v45  ;;  %v1515_v49 = vpop.f32.mrb[43].mxu0  ;;  %v2237_v50 = vmax.f32 %v2898_v20, %v1556_v48  ;;  %v1558_v52 = vpop.f32.mrb[43].mxu1 }
 0x140   : > { %v2236_v51 = vmax.f32 %v2900_v21, %v1515_v49  ;;  %v2238_v53 = vmax.f32 %v2902_v23, %v1558_v52 }
 0x144   : > { %v1595_v54 = vpop.f32.mrb[44].mxu0  ;;  %v1638_v56 = vpop.f32.mrb[44].mxu1 }
 0x145   : > { %v2231_v55 = vmax.f32 %v2904_v25, %v1595_v54  ;;  %v1597_v57 = vpop.f32.mrb[45].mxu0  ;;  %v2233_v58 = vmax.f32 %v2906_v28, %v1638_v56  ;;  %v1640_v60 = vpop.f32.mrb[45].mxu1 }
 0x146   : > { %v2232_v59 = vmax.f32 %v2908_v29, %v1597_v57  ;;  %v1599_v61 = vpop.f32.mrb[46].mxu0  ;;  %v2234_v62 = vmax.f32 %v2910_v32, %v1640_v60  ;;  %v1642_v1 = vpop.f32.mrb[46].mxu1 }
 0x147   : > { %v2239_v63 = vmax.f32 %v2912_v33, %v1599_v61  ;;  %v1601_v2 = vpop.f32.mrb[47].mxu0  ;;  %v2241_v3 = vmax.f32 %v2914_v36, %v1642_v1  ;;  %v1644_v5 = vpop.f32.mrb[47].mxu1 }
 0x148   : > { %v2240_v4 = vmax.f32 %v2916_v0, %v1601_v2  ;;  %v2242_v6 = vmax.f32 %v2918_v38, %v1644_v5 }
 0x14c   : > { %v1681_v7 = vpop.f32.mrb[48].mxu0  ;;  %v1724_v9 = vpop.f32.mrb[48].mxu1 }
 0x14d   : > { %v2936_v8 = vmax.f32 %v2227_v39, %v1681_v7  ;;  %v1683_v10 = vpop.f32.mrb[49].mxu0  ;;  %v2938_v11 = vmax.f32 %v2229_v42, %v1724_v9  ;;  %v1726_v13 = vpop.f32.mrb[49].mxu1 }
 0x14e   : > { %v2940_v12 = vmax.f32 %v2228_v43, %v1683_v10  ;;  %v1685_v15 = vpop.f32.mrb[50].mxu0  ;;  %v2942_v16 = vmax.f32 %v2230_v46, %v1726_v13  ;;  %v1728_v18 = vpop.f32.mrb[50].mxu1 }
 0x14f   : > { %v2944_v17 = vmax.f32 %v2235_v47, %v1685_v15  ;;  %v1687_v19 = vpop.f32.mrb[51].mxu0  ;;  %v2946_v20 = vmax.f32 %v2237_v50, %v1728_v18  ;;  %v1730_v22 = vpop.f32.mrb[51].mxu1 }
 0x150   : > { %v2948_v21 = vmax.f32 %v2236_v51, %v1687_v19  ;;  %v2950_v23 = vmax.f32 %v2238_v53, %v1730_v22 }
 0x154   : > { %v1767_v24 = vpop.f32.mrb[52].mxu0  ;;  %v1810_v26 = vpop.f32.mrb[52].mxu1 }
 0x155   : > { %v2952_v25 = vmax.f32 %v2231_v55, %v1767_v24  ;;  %v1769_v27 = vpop.f32.mrb[53].mxu0  ;;  %v2954_v28 = vmax.f32 %v2233_v58, %v1810_v26  ;;  %v1812_v30 = vpop.f32.mrb[53].mxu1 }
 0x156   : > { %v2956_v29 = vmax.f32 %v2232_v59, %v1769_v27  ;;  %v1771_v31 = vpop.f32.mrb[54].mxu0  ;;  %v2958_v32 = vmax.f32 %v2234_v62, %v1812_v30  ;;  %v1814_v34 = vpop.f32.mrb[54].mxu1 }
 0x157   : > { %v2960_v33 = vmax.f32 %v2239_v63, %v1771_v31  ;;  %v1773_v35 = vpop.f32.mrb[55].mxu0  ;;  %v2962_v36 = vmax.f32 %v2241_v3, %v1814_v34  ;;  %v1816_v37 = vpop.f32.mrb[55].mxu1 }
 0x158   : > { %v2964_v0 = vmax.f32 %v2240_v4, %v1773_v35  ;;  %v2966_v38 = vmax.f32 %v2242_v6, %v1816_v37  ;;  %v2976_v55 = vpop.permute.xlu0 %2295 }
 0x15c   : > { %v1853_v14 = vpop.f32.mrb[56].mxu0  ;;  %v1896_v40 = vpop.f32.mrb[56].mxu1 }
 0x15d   : > { %v2259_v39 = vmax.f32 %v2936_v8, %v1853_v14  ;;  %v1855_v41 = vpop.f32.mrb[57].mxu0  ;;  %v2261_v42 = vmax.f32 %v2938_v11, %v1896_v40  ;;  %v1898_v44 = vpop.f32.mrb[57].mxu1 }
 0x15e   : > { %v2260_v43 = vmax.f32 %v2940_v12, %v1855_v41  ;;  %v1857_v45 = vpop.f32.mrb[58].mxu0  ;;  %v2262_v46 = vmax.f32 %v2942_v16, %v1898_v44  ;;  %v1900_v48 = vpop.f32.mrb[58].mxu1 }
 0x15f   : > { %v2267_v47 = vmax.f32 %v2944_v17, %v1857_v45  ;;  %v1859_v49 = vpop.f32.mrb[59].mxu0  ;;  %v2269_v50 = vmax.f32 %v2946_v20, %v1900_v48  ;;  %v1902_v52 = vpop.f32.mrb[59].mxu1 }
 0x160   : > { %v2268_v51 = vmax.f32 %v2948_v21, %v1859_v49  ;;  %v2270_v53 = vmax.f32 %v2950_v23, %v1902_v52  ;;  %v2995_v9 = vpop.permute.xlu0 %2300 }
 0x164   : > { %v1939_v54 = vpop.f32.mrb[60].mxu0  ;;  %v1982_v57 = vpop.f32.mrb[60].mxu1 }
 0x165   : > { %v2263_v56 = vmax.f32 %v2952_v25, %v1939_v54  ;;  %v1941_v58 = vpop.f32.mrb[61].mxu0  ;;  %v2265_v59 = vmax.f32 %v2954_v28, %v1982_v57  ;;  %v1984_v61 = vpop.f32.mrb[61].mxu1 }
 0x166   : > { %v2264_v60 = vmax.f32 %v2956_v29, %v1941_v58  ;;  %v1943_v62 = vpop.f32.mrb[62].mxu0  ;;  %v2266_v63 = vmax.f32 %v2958_v32, %v1984_v61  ;;  %v2983_v2 = vpop.f32.mrb[62].mxu1 }
 0x167   : > { %v2271_v1 = vmax.f32 %v2960_v33, %v1943_v62  ;;  %v2985_v3 = vpop.f32.mrb[63].mxu0  ;;  %v2273_v4 = vmax.f32 %v2962_v36, %v2983_v2  ;;  %v2991_v6 = vpop.f32.mrb[63].mxu1 }
 0x168   : > { %v2272_v5 = vmax.f32 %v2964_v0, %v2985_v3  ;;  %v2274_v7 = vmax.f32 %v2966_v38, %v2991_v6 }
 0x16c   : > { %v2025_v8 = vpop.f32.mrb[64].mxu0  ;;  %v2068_v11 = vpop.f32.mrb[64].mxu1 }
 0x16d   : > { %v2275_v10 = vmax.f32 %v2259_v39, %v2025_v8  ;;  %v2027_v12 = vpop.f32.mrb[65].mxu0  ;;  %v2277_v13 = vmax.f32 %v2261_v42, %v2068_v11  ;;  %v2070_v16 = vpop.f32.mrb[65].mxu1 }
 0x16e   : > { %v2276_v15 = vmax.f32 %v2260_v43, %v2027_v12  ;;  %v2029_v17 = vpop.f32.mrb[66].mxu0  ;;  %v2278_v19 = vmax.f32 %v2262_v46, %v2070_v16  ;;  %v2072_v21 = vpop.f32.mrb[66].mxu1 }
 0x16f   : > { %v2303_v18 = vadd.f32 %v2976_v55, %v2275_v10  ;;  %v2283_v20 = vmax.f32 %v2267_v47, %v2029_v17  ;;  %v2031_v22 = vpop.f32.mrb[67].mxu0  ;;  %v2305_v23 = vadd.f32 %v2976_v55, %v2277_v13  ;;  %v2285_v25 = vmax.f32 %v2269_v50, %v2072_v21  ;;  %v2074_v27 = vpop.f32.mrb[67].mxu1 }
 0x170   : > { %v2304_v24 = vadd.f32 %v2976_v55, %v2276_v15  ;;  %v2284_v26 = vmax.f32 %v2268_v51, %v2031_v22  ;;  %v2306_v29 = vadd.f32 %v2976_v55, %v2278_v19  ;;  %v2286_v30 = vmax.f32 %v2270_v53, %v2074_v27 }
 0x171   : > { %v2319_v28 = vmax.f32 %v2303_v18, 0.0  ;;  %v2311_v31 = vadd.f32 %v2995_v9, %v2283_v20  ;;  %v2321_v32 = vmax.f32 %v2305_v23, 0.0  ;;  %v2313_v35 = vadd.f32 %v2995_v9, %v2285_v25 }
 0x172   : > { %v2320_v33 = vmax.f32 %v2304_v24, 0.0  ;;  %v2312_v34 = vadd.f32 %v2995_v9, %v2284_v26  ;;  %v2322_v36 = vmax.f32 %v2306_v29, 0.0  ;;  %v2314_v0 = vadd.f32 %v2995_v9, %v2286_v30 }
 0x173   : > { %v2327_v37 = vmax.f32 %v2311_v31, 0.0  ;;  %v2329_v40 = vmax.f32 %v2313_v35, 0.0 }
 0x174   : > { %v2574_v14 = vpack.c.bf16 %v2320_v33, %v2319_v28  ;;  %v2328_v39 = vmax.f32 %v2312_v34, 0.0  ;;  %v2111_v41 = vpop.f32.mrb[68].mxu0  ;;  %v2575_v42 = vpack.c.bf16 %v2322_v36, %v2321_v32  ;;  %v2330_v43 = vmax.f32 %v2314_v0, 0.0  ;;  %v2154_v45 = vpop.f32.mrb[68].mxu1 }
 0x175   : > { %v2279_v44 = vmax.f32 %v2263_v56, %v2111_v41  ;;  %v2113_v46 = vpop.f32.mrb[69].mxu0  ;;  %v2281_v48 = vmax.f32 %v2265_v59, %v2154_v45  ;;  %v2156_v50 = vpop.f32.mrb[69].mxu1 }
 0x176   : > { %2383 = vst [vmem:[%s3008_s27] sm:$0xff] %v2574_v14  ;;  %v2578_v47 = vpack.c.bf16 %v2328_v39, %v2327_v37  ;;  %v2280_v49 = vmax.f32 %v2264_v60, %v2113_v46  ;;  %v2115_v51 = vpop.f32.mrb[70].mxu0  ;;  %2384 = vst [vmem:[%s3008_s27 + $0x8] sm:$0xff] %v2575_v42  ;;  %v2579_v52 = vpack.c.bf16 %v2330_v43, %v2329_v40  ;;  %v2158_v58 = vpop.f32.mrb[70].mxu1 }
 0x177   : > { %v2307_v53 = vadd.f32 %v2976_v55, %v2279_v44  ;;  %v2282_v54 = vmax.f32 %v2266_v63, %v2156_v50  ;;  %v2287_v57 = vmax.f32 %v2271_v1, %v2115_v51  ;;  %v2117_v61 = vpop.f32.mrb[71].mxu0  ;;  %v2309_v56 = vadd.f32 %v2976_v55, %v2281_v48  ;;  %v2160_v59 = vpop.f32.mrb[71].mxu1 }
 0x178   : > { %2387 = vst [vmem:[%s3008_s27 + $0x20] sm:$0xff] %v2578_v47  ;;  %v2308_v62 = vadd.f32 %v2976_v55, %v2280_v49  ;;  %v2289_v2 = vmax.f32 %v2273_v4, %v2158_v58  ;;  %v2288_v3 = vmax.f32 %v2272_v5, %v2117_v61  ;;  %2388 = vst [vmem:[%s3008_s27 + $0x28] sm:$0xff] %v2579_v52 }
 0x179   : > { %v2323_v60 = vmax.f32 %v2307_v53, 0.0  ;;  %v2310_v8 = vadd.f32 %v2976_v55, %v2282_v54  ;;  %v2315_v10 = vadd.f32 %v2995_v9, %v2287_v57  ;;  %v2290_v63 = vmax.f32 %v2274_v7, %v2160_v59 }
 0x17a   : > { %v2325_v1 = vmax.f32 %v2309_v56, 0.0  ;;  %v2324_v11 = vmax.f32 %v2308_v62, 0.0  ;;  %v2317_v4 = vadd.f32 %v2995_v9, %v2289_v2  ;;  %v2316_v5 = vadd.f32 %v2995_v9, %v2288_v3 }
 0x17b   : > { %v2326_v12 = vmax.f32 %v2310_v8, 0.0  ;;  %v2331_v13 = vmax.f32 %v2315_v10, 0.0  ;;  %v2318_v15 = vadd.f32 %v2995_v9, %v2290_v63 }
 0x17c   : > { %v2576_v55 = vpack.c.bf16 %v2324_v11, %v2323_v60  ;;  %v2333_v16 = vmax.f32 %v2317_v4, 0.0  ;;  %v2332_v17 = vmax.f32 %v2316_v5, 0.0 }
 0x17d   : > { %v2577_v18 = vpack.c.bf16 %v2326_v12, %v2325_v1  ;;  %v2334_v19 = vmax.f32 %v2318_v15, 0.0 }
 0x17e   : > { %2385 = vst [vmem:[%s3008_s27 + $0x10] sm:$0xff] %v2576_v55  ;;  %v2580_v38 = vpack.c.bf16 %v2332_v17, %v2331_v13 }
 0x17f   : > { %2386 = vst [vmem:[%s3008_s27 + $0x18] sm:$0xff] %v2577_v18  ;;  %v2581_v6 = vpack.c.bf16 %v2334_v19, %v2333_v16 }
 0x180   : > { %2389 = vst [vmem:[%s3008_s27 + $0x30] sm:$0xff] %v2580_v38 }
 0x181   : > { %2390 = vst [vmem:[%s3008_s27 + $0x38] sm:$0xff] %v2581_v6 }
 0x182 PF: > { %s13_s12 = sadd.s32 1, %s2600_s12  }
 0x183   : > { %p10_p4 = scmp.ge.s32.totalorder %s13_s12, 4  }
 0x185   :  { %12 = sbr.rel (!%p10_p4) target bundleno = 1 (0x1), region = 62 }

// kernel: keypoint_model_forward.4
= control target key start
LH: loop header
LB: loop body
LE: loop exit
PB: predicated region body
PF: predicated region fallthrough
CT: control target
= control target key end

     0   :  { %s1412_s12 = smov 0   ;;  %s1598_s0 = inlined_call_operand.vmem [shape: bf16[2,144,1152], index: 0, kind: input, shape index: {}]   ;;  %s1599_s1 = inlined_call_operand.vmem [shape: bf16[32,144], index: 1, kind: input, shape index: {}]   ;;  %s1600_s2 = inlined_call_operand.vmem [shape: f32[32,1], index: 2, kind: input, shape index: {}]   ;;  %s1601_s3 = inlined_call_operand.vmem [shape: bf16[2,32,128], index: 3, kind: output, shape index: {}]  }
   0x1 LB: > { %s1105_s13 = sadd.s32 4294967295, %s1389_s12   ;;  %p1109_p0 = scmp.ge.s32.totalorder %s1389_s12, 1  ;;  %s1389_s12 = sphi %s1412_s12, %s13_s12  }
   0x2   : > { %p137_p1 = scmp.lt.s32.totalorder %s1389_s12, 3 }
   0x4   : > { %p138_p2 = pnand %p1109_p0, %p137_p1 }
   0x5   : > { %p161_p3 = scmp.lt.s32.totalorder (!%p138_p2), %s1105_s13, 1  ;;  %v1423_v0 = vld [vmem:[%s1599_s1 + $0x4] ss:$8 sps:$4 sm:$0xff] (!%p138_p2)   ;;  %vm698_vm0 = vcmask (!%p138_p2), 130048   ;;  %v1000_v1 = vld [vmem:[%s1600_s2 + $0x10] sm:$0xff] (!%p138_p2)  ;;  %v1391_v2 = vmov (!%p138_p2), 0  }
   0x6   : > { %141 = sbr.rel (%p138_p2) target bundleno = 349 (0x15d), region = 32  ;;  %1198 = vmatprep.mubr.msk.bf16.mxu0 (!%p138_p2), %vm698_vm0, %v1423_v0  ;;  %1200 = vmatprep.mubr.msk.bf16.mxu1 (!%p138_p2), %vm698_vm0, %v1423_v0  ;;  %v998_v3 = vld [vmem:[%s1600_s2] sm:$0xff] (!%p138_p2)  ;;  %v1001_v4 = vld [vmem:[%s1600_s2 + $0x18] sm:$0xff] (!%p138_p2)  ;;  %v999_v5 = vld [vmem:[%s1600_s2 + $0x8] sm:$0xff] (!%p138_p2) }
   0x7   : > { %1259 = vset.pattern.permute.xlu1 (!%p138_p2), %v1391_v2  ;;  %1258 = vset.pattern.permute.xlu0 (!%p138_p2), %v1391_v2  ;;  %v1492_v44 = vld [vmem:[%s1599_s1] ss:$8 sps:$4 sm:$0xff] (!%p138_p2)   ;;  %v1501_v49 = vld [vmem:[%s1599_s1 + $0x14] ss:$8 sps:$4 sm:$0xff] (!%p138_p2)   ;;  %v1514_v54 = vld [vmem:[%s1599_s1 + $0x10] ss:$8 sps:$4 sm:$0xff] (!%p138_p2)  }
   0x8   : > { %1014 = vperm.xlu1 (!%p138_p2), %1259, %v1000_v1   ;;  %1004 = vperm.xlu0 (!%p138_p2), %1258, %v998_v3  }
   0xc   : > { %1019 = vperm.xlu1 (!%p138_p2), %1259, %v1001_v4   ;;  %1009 = vperm.xlu0 (!%p138_p2), %1258, %v999_v5  }
   0xd   : > { %s1603_s13 = smov (!%p161_p3, %s1105_s13), 1 }
   0xe   : > { %s1248_s20 = smul.u32 648, %s1603_s13  ;;  %s1214_s7 = sshll.u32 %s1603_s13, 4 }
   0xf   : > { %s170_s10 = scalar_lea.vmem %s1601_s3, %s1214_s7 }
  0x10   : > { %s1449_s27 = scalar_lea.vmem %s1598_s0, %s1248_s20 }
  0x11   : > { %v1260_v6 = vld [vmem:[%s1449_s27 + $0x4] ss:$36 sps:$4 sm:$0xff]   ;;  %v1262_v7 = vld [vmem:[%s1449_s27 + $0xc] ss:$36 sps:$4 sm:$0xff]   ;;  %v1268_v11 = vld [vmem:[%s1449_s27 + $0x54] ss:$36 sps:$4 sm:$0xff]  }
  0x12   : > { %705 = vmatprep.subr.bf16.mxu0 %v1260_v6  ;;  %v1264_v8 = vld [vmem:[%s1449_s27] ss:$36 sps:$4 sm:$0xff]   ;;  %v1265_v9 = vld [vmem:[%s1449_s27 + $0x8] ss:$36 sps:$4 sm:$0xff]   ;;  %758 = vmatprep.subr.bf16.mxu1 %v1262_v7  ;;  %v1271_v13 = vld [vmem:[%s1449_s27 + $0x50] ss:$36 sps:$4 sm:$0xff]  }
  0x13   : > { %v1266_v10 = vld [vmem:[%s1449_s27 + $0x4c] ss:$36 sps:$4 sm:$0xff]   ;;  %706 = vmatpush1.bf16.msra.mxu0 %v1264_v8  ;;  %759 = vmatpush1.bf16.msra.mxu1 %v1265_v9  ;;  %v1272_v14 = vld [vmem:[%s1449_s27 + $0x94] ss:$36 sps:$4 sm:$0xff]   ;;  %v1274_v15 = vld [vmem:[%s1449_s27 + $0x9c] ss:$36 sps:$4 sm:$0xff]  }
  0x14   : > { %v1270_v12 = vld [vmem:[%s1449_s27 + $0x48] ss:$36 sps:$4 sm:$0xff]   ;;  %707 = vmatprep.subr.bf16.mxu0 %v1266_v10  ;;  %760 = vmatprep.subr.bf16.mxu1 %v1268_v11  ;;  %v1276_v16 = vld [vmem:[%s1449_s27 + $0x90] ss:$36 sps:$4 sm:$0xff]   ;;  %v1277_v17 = vld [vmem:[%s1449_s27 + $0x98] ss:$36 sps:$4 sm:$0xff]  }
  0x15   : > { %v1278_v18 = vld [vmem:[%s1449_s27 + $0xdc] ss:$36 sps:$4 sm:$0xff]   ;;  %v1280_v19 = vld [vmem:[%s1449_s27 + $0xe4] ss:$36 sps:$4 sm:$0xff]   ;;  %v1286_v23 = vld [vmem:[%s1449_s27 + $0x12c] ss:$36 sps:$4 sm:$0xff]  }
  0x16   : > { %v1282_v20 = vld [vmem:[%s1449_s27 + $0xd8] ss:$36 sps:$4 sm:$0xff]   ;;  %v1283_v21 = vld [vmem:[%s1449_s27 + $0xe0] ss:$36 sps:$4 sm:$0xff]   ;;  %v1289_v25 = vld [vmem:[%s1449_s27 + $0x128] ss:$36 sps:$4 sm:$0xff]  }
  0x17   : > { %708 = vmatpush1.bf16.msra.mxu0 %v1270_v12  ;;  %761 = vmatpush1.bf16.msra.mxu1 %v1271_v13  ;;  %v1284_v22 = vld [vmem:[%s1449_s27 + $0x124] ss:$36 sps:$4 sm:$0xff]   ;;  %v1290_v26 = vld [vmem:[%s1449_s27 + $0x16c] ss:$36 sps:$4 sm:$0xff]   ;;  %v1292_v27 = vld [vmem:[%s1449_s27 + $0x174] ss:$36 sps:$4 sm:$0xff]  }
  0x18   : > { %709 = vmatprep.subr.bf16.mxu0 %v1272_v14  ;;  %762 = vmatprep.subr.bf16.mxu1 %v1274_v15  ;;  %v1288_v24 = vld [vmem:[%s1449_s27 + $0x120] ss:$36 sps:$4 sm:$0xff]   ;;  %v1294_v28 = vld [vmem:[%s1449_s27 + $0x168] ss:$36 sps:$4 sm:$0xff]   ;;  %v1295_v29 = vld [vmem:[%s1449_s27 + $0x170] ss:$36 sps:$4 sm:$0xff]  }
  0x19   : > { %v1296_v30 = vld [vmem:[%s1449_s27 + $0x1b4] ss:$36 sps:$4 sm:$0xff]   ;;  %v1298_v31 = vld [vmem:[%s1449_s27 + $0x1bc] ss:$36 sps:$4 sm:$0xff]   ;;  %v1304_v35 = vld [vmem:[%s1449_s27 + $0x204] ss:$36 sps:$4 sm:$0xff]  }
  0x1a   : > { %v1300_v32 = vld [vmem:[%s1449_s27 + $0x1b0] ss:$36 sps:$4 sm:$0xff]   ;;  %v1301_v33 = vld [vmem:[%s1449_s27 + $0x1b8] ss:$36 sps:$4 sm:$0xff]   ;;  %v1307_v37 = vld [vmem:[%s1449_s27 + $0x200] ss:$36 sps:$4 sm:$0xff]  }
  0x1b   : > { %710 = vmatpush1.bf16.msra.mxu0 %v1276_v16  ;;  %763 = vmatpush1.bf16.msra.mxu1 %v1277_v17  ;;  %v1302_v34 = vld [vmem:[%s1449_s27 + $0x1fc] ss:$36 sps:$4 sm:$0xff]   ;;  %v1308_v38 = vld [vmem:[%s1449_s27 + $0x244] ss:$36 sps:$4 sm:$0xff]   ;;  %v1310_v39 = vld [vmem:[%s1449_s27 + $0x24c] ss:$36 sps:$4 sm:$0xff]  }
  0x1c   : > { %711 = vmatprep.subr.bf16.mxu0 %v1278_v18  ;;  %764 = vmatprep.subr.bf16.mxu1 %v1280_v19  ;;  %v1306_v36 = vld [vmem:[%s1449_s27 + $0x1f8] ss:$36 sps:$4 sm:$0xff]   ;;  %v1312_v40 = vld [vmem:[%s1449_s27 + $0x240] ss:$36 sps:$4 sm:$0xff]   ;;  %v1313_v41 = vld [vmem:[%s1449_s27 + $0x248] ss:$36 sps:$4 sm:$0xff]  }
  0x1d   : > { %v1319_v42 = vld [vmem:[%s1449_s27 + $0x14] ss:$36 sps:$4 sm:$0xff]   ;;  %v1322_v43 = vld [vmem:[%s1449_s27 + $0x1c] ss:$36 sps:$4 sm:$0xff]   ;;  %v1328_v48 = vld [vmem:[%s1449_s27 + $0x64] ss:$36 sps:$4 sm:$0xff]  }
  0x1e   : > { %v1317_v45 = vld [vmem:[%s1449_s27 + $0x10] ss:$36 sps:$4 sm:$0xff]   ;;  %v1320_v46 = vld [vmem:[%s1449_s27 + $0x18] ss:$36 sps:$4 sm:$0xff]   ;;  %v1326_v51 = vld [vmem:[%s1449_s27 + $0x60] ss:$36 sps:$4 sm:$0xff]  }
  0x1f   : > { %712 = vmatpush1.bf16.msra.mxu0 %v1282_v20  ;;  %765 = vmatpush1.bf16.msra.mxu1 %v1283_v21  ;;  %v1325_v47 = vld [vmem:[%s1449_s27 + $0x5c] ss:$36 sps:$4 sm:$0xff]   ;;  %v1331_v52 = vld [vmem:[%s1449_s27 + $0xa4] ss:$36 sps:$4 sm:$0xff]   ;;  %v1334_v53 = vld [vmem:[%s1449_s27 + $0xac] ss:$36 sps:$4 sm:$0xff]  }
  0x20   : > { %713 = vmatprep.subr.bf16.mxu0 %v1284_v22  ;;  %766 = vmatprep.subr.bf16.mxu1 %v1286_v23  ;;  %v1323_v50 = vld [vmem:[%s1449_s27 + $0x58] ss:$36 sps:$4 sm:$0xff]   ;;  %v1329_v55 = vld [vmem:[%s1449_s27 + $0xa0] ss:$36 sps:$4 sm:$0xff]   ;;  %v1332_v56 = vld [vmem:[%s1449_s27 + $0xa8] ss:$36 sps:$4 sm:$0xff]  }
  0x21   : > { %v1337_v57 = vld [vmem:[%s1449_s27 + $0xec] ss:$36 sps:$4 sm:$0xff]   ;;  %v1340_v58 = vld [vmem:[%s1449_s27 + $0xf4] ss:$36 sps:$4 sm:$0xff]   ;;  %v1346_v62 = vld [vmem:[%s1449_s27 + $0x13c] ss:$36 sps:$4 sm:$0xff]  }
  0x22   : > { %v1335_v59 = vld [vmem:[%s1449_s27 + $0xe8] ss:$36 sps:$4 sm:$0xff]   ;;  %v1338_v60 = vld [vmem:[%s1449_s27 + $0xf0] ss:$36 sps:$4 sm:$0xff]   ;;  %v1344_v1 = vld [vmem:[%s1449_s27 + $0x138] ss:$36 sps:$4 sm:$0xff]  }
  0x23   : > { %714 = vmatpush1.bf16.msra.mxu0 %v1288_v24  ;;  %767 = vmatpush1.bf16.msra.mxu1 %v1289_v25  ;;  %v1343_v61 = vld [vmem:[%s1449_s27 + $0x134] ss:$36 sps:$4 sm:$0xff]   ;;  %v1349_v3 = vld [vmem:[%s1449_s27 + $0x17c] ss:$36 sps:$4 sm:$0xff]   ;;  %v1352_v4 = vld [vmem:[%s1449_s27 + $0x184] ss:$36 sps:$4 sm:$0xff]  }
  0x24   : > { %715 = vmatprep.subr.bf16.mxu0 %v1290_v26  ;;  %768 = vmatprep.subr.bf16.mxu1 %v1292_v27  ;;  %v1341_v63 = vld [vmem:[%s1449_s27 + $0x130] ss:$36 sps:$4 sm:$0xff]   ;;  %v1347_v5 = vld [vmem:[%s1449_s27 + $0x178] ss:$36 sps:$4 sm:$0xff]   ;;  %v1350_v6 = vld [vmem:[%s1449_s27 + $0x180] ss:$36 sps:$4 sm:$0xff]  }
  0x25   : > { %v1358_v7 = vld [vmem:[%s1449_s27 + $0x1c4] ss:$36 sps:$4 sm:$0xff]   ;;  %v1361_v8 = vld [vmem:[%s1449_s27 + $0x1cc] ss:$36 sps:$4 sm:$0xff]   ;;  %v1367_v12 = vld [vmem:[%s1449_s27 + $0x214] ss:$36 sps:$4 sm:$0xff]  }
  0x26   : > { %v1356_v9 = vld [vmem:[%s1449_s27 + $0x1c0] ss:$36 sps:$4 sm:$0xff]   ;;  %v1359_v10 = vld [vmem:[%s1449_s27 + $0x1c8] ss:$36 sps:$4 sm:$0xff]   ;;  %v1365_v14 = vld [vmem:[%s1449_s27 + $0x210] ss:$36 sps:$4 sm:$0xff]  }
  0x27   : > { %716 = vmatpush1.bf16.msra.mxu0 %v1294_v28  ;;  %769 = vmatpush1.bf16.msra.mxu1 %v1295_v29  ;;  %v1364_v11 = vld [vmem:[%s1449_s27 + $0x20c] ss:$36 sps:$4 sm:$0xff]   ;;  %v1370_v15 = vld [vmem:[%s1449_s27 + $0x254] ss:$36 sps:$4 sm:$0xff]   ;;  %v1373_v16 = vld [vmem:[%s1449_s27 + $0x25c] ss:$36 sps:$4 sm:$0xff]  }
  0x28   : > { %717 = vmatprep.subr.bf16.mxu0 %v1296_v30  ;;  %770 = vmatprep.subr.bf16.mxu1 %v1298_v31  ;;  %v1362_v13 = vld [vmem:[%s1449_s27 + $0x208] ss:$36 sps:$4 sm:$0xff]   ;;  %v1368_v17 = vld [vmem:[%s1449_s27 + $0x250] ss:$36 sps:$4 sm:$0xff]   ;;  %v1371_v18 = vld [vmem:[%s1449_s27 + $0x258] ss:$36 sps:$4 sm:$0xff]  }
  0x29   : > { %v1374_v19 = vld [vmem:[%s1449_s27 + $0x20] ss:$36 sps:$4 sm:$0xff]   ;;  %v1375_v20 = vld [vmem:[%s1449_s27 + $0x68] ss:$36 sps:$4 sm:$0xff]   ;;  %v1376_v21 = vld [vmem:[%s1449_s27 + $0xb0] ss:$36 sps:$4 sm:$0xff]  }
  0x2a   : > { %v1377_v22 = vld [vmem:[%s1449_s27 + $0xf8] ss:$36 sps:$4 sm:$0xff]   ;;  %v1378_v23 = vld [vmem:[%s1449_s27 + $0x140] ss:$36 sps:$4 sm:$0xff]   ;;  %v1379_v24 = vld [vmem:[%s1449_s27 + $0x188] ss:$36 sps:$4 sm:$0xff]  }
  0x2b   : > { %718 = vmatpush1.bf16.msra.mxu0 %v1300_v32  ;;  %771 = vmatpush1.bf16.msra.mxu1 %v1301_v33  ;;  %v1381_v25 = vld [vmem:[%s1449_s27 + $0x218] ss:$36 sps:$4 sm:$0xff]   ;;  %v1382_v26 = vld [vmem:[%s1449_s27 + $0x260] ss:$36 sps:$4 sm:$0xff]  }
  0x2c   : > { %719 = vmatprep.subr.bf16.mxu0 %v1302_v34  ;;  %772 = vmatprep.subr.bf16.mxu1 %v1304_v35 }
  0x2f   : > { %720 = vmatpush1.bf16.msra.mxu0 %v1306_v36  ;;  %773 = vmatpush1.bf16.msra.mxu1 %v1307_v37 }
  0x30   : > { %721 = vmatprep.subr.bf16.mxu0 %v1308_v38  ;;  %774 = vmatprep.subr.bf16.mxu1 %v1310_v39 }
  0x33   : > { %722 = vmatpush1.bf16.msra.mxu0 %v1312_v40  ;;  %775 = vmatpush1.bf16.msra.mxu1 %v1313_v41 }
  0x34   : > { %811 = vmatprep.subr.bf16.mxu0 %v1319_v42  ;;  %864 = vmatprep.subr.bf16.mxu1 %v1322_v43 }
  0x36   : > { %738 = vmatmul.mubr.bf16.vlgmr.msra.gmra.mrb[0].mxu0 %v1492_v44  ;;  %791 = vmatmul.mubr.bf16.vlgmr.msra.gmra.mrb[0].mxu1 %v1492_v44 }
  0x37   : > { %812 = vmatpush1.bf16.msra.mxu0 %v1317_v45  ;;  %865 = vmatpush1.bf16.msra.mxu1 %v1320_v46 }
  0x38   : > { %813 = vmatprep.subr.bf16.mxu0 %v1325_v47  ;;  %866 = vmatprep.subr.bf16.mxu1 %v1328_v48 }
  0x39   : > { %1199 = vmatprep.mubr.msk.bf16.mxu0 %vm698_vm0, %v1501_v49  ;;  %1201 = vmatprep.mubr.msk.bf16.mxu1 %vm698_vm0, %v1501_v49 }
  0x3b   : > { %814 = vmatpush1.bf16.msra.mxu0 %v1323_v50  ;;  %867 = vmatpush1.bf16.msra.mxu1 %v1326_v51 }
  0x3c   : > { %815 = vmatprep.subr.bf16.mxu0 %v1331_v52  ;;  %868 = vmatprep.subr.bf16.mxu1 %v1334_v53 }
  0x3e   : > { %748 = vmatmul.mubr.bf16.gmra.mrb[4].mxu0 %v1514_v54  ;;  %801 = vmatmul.mubr.bf16.gmra.mrb[4].mxu1 %v1514_v54 }
  0x3f   : > { %816 = vmatpush1.bf16.msra.mxu0 %v1329_v55  ;;  %869 = vmatpush1.bf16.msra.mxu1 %v1332_v56 }
  0x40   : > { %817 = vmatprep.subr.bf16.mxu0 %v1337_v57  ;;  %870 = vmatprep.subr.bf16.mxu1 %v1340_v58 }
  0x41   : > { %1202 = vmatprep.mubr.msk.bf16.mxu0 %vm698_vm0, %v1423_v0  ;;  %1204 = vmatprep.mubr.msk.bf16.mxu1 %vm698_vm0, %v1423_v0 }
  0x43   : > { %818 = vmatpush1.bf16.msra.mxu0 %v1335_v59  ;;  %871 = vmatpush1.bf16.msra.mxu1 %v1338_v60 }
  0x44   : > { %819 = vmatprep.subr.bf16.mxu0 %v1343_v61  ;;  %872 = vmatprep.subr.bf16.mxu1 %v1346_v62 }
  0x47   : > { %820 = vmatpush1.bf16.msra.mxu0 %v1341_v63  ;;  %873 = vmatpush1.bf16.msra.mxu1 %v1344_v1 }
  0x48   : > { %821 = vmatprep.subr.bf16.mxu0 %v1349_v3  ;;  %874 = vmatprep.subr.bf16.mxu1 %v1352_v4 }
  0x4b   : > { %822 = vmatpush1.bf16.msra.mxu0 %v1347_v5  ;;  %875 = vmatpush1.bf16.msra.mxu1 %v1350_v6 }
  0x4c   : > { %823 = vmatprep.subr.bf16.mxu0 %v1358_v7  ;;  %876 = vmatprep.subr.bf16.mxu1 %v1361_v8 }
  0x4f   : > { %824 = vmatpush1.bf16.msra.mxu0 %v1356_v9  ;;  %877 = vmatpush1.bf16.msra.mxu1 %v1359_v10 }
  0x50   : > { %825 = vmatprep.subr.bf16.mxu0 %v1364_v11  ;;  %878 = vmatprep.subr.bf16.mxu1 %v1367_v12 }
  0x53   : > { %826 = vmatpush1.bf16.msra.mxu0 %v1362_v13  ;;  %879 = vmatpush1.bf16.msra.mxu1 %v1365_v14 }
  0x54   : > { %827 = vmatprep.subr.bf16.mxu0 %v1370_v15  ;;  %880 = vmatprep.subr.bf16.mxu1 %v1373_v16 }
  0x57   : > { %828 = vmatpush1.bf16.msra.mxu0 %v1368_v17  ;;  %881 = vmatpush1.bf16.msra.mxu1 %v1371_v18 }
  0x58   : > { %917 = vmatprep.subr.bf16.mxu0 %v1391_v2  ;;  %1230 = vmatprep.subr.bf16.mxu1 %v1391_v2 }
  0x5a   : > { %844 = vmatmul.mubr.bf16.vlgmr.msra.gmra.mrb[8].mxu0 %v1492_v44  ;;  %897 = vmatmul.mubr.bf16.vlgmr.msra.gmra.mrb[8].mxu1 %v1492_v44 }
  0x5b   : > { %918 = vmatpush1.bf16.msra.mxu0 %v1374_v19  ;;  %1239 = vmatpush1.bf16.msra.mxu1 %v1374_v19 }
  0x5c   : > { %919 = vmatprep.subr.bf16.mxu0 %v1391_v2  ;;  %1231 = vmatprep.subr.bf16.mxu1 %v1391_v2 }
  0x5d   : > { %1203 = vmatprep.mubr.msk.bf16.mxu0 %vm698_vm0, %v1501_v49  ;;  %1205 = vmatprep.mubr.msk.bf16.mxu1 %vm698_vm0, %v1501_v49 }
  0x5f   : > { %920 = vmatpush1.bf16.msra.mxu0 %v1375_v20  ;;  %1240 = vmatpush1.bf16.msra.mxu1 %v1375_v20 }
  0x60   : > { %921 = vmatprep.subr.bf16.mxu0 %v1391_v2  ;;  %1232 = vmatprep.subr.bf16.mxu1 %v1391_v2 }
  0x62   : > { %854 = vmatmul.mubr.bf16.gmra.mrb[12].mxu0 %v1514_v54  ;;  %907 = vmatmul.mubr.bf16.gmra.mrb[12].mxu1 %v1514_v54 }
  0x63   : > { %922 = vmatpush1.bf16.msra.mxu0 %v1376_v21  ;;  %1241 = vmatpush1.bf16.msra.mxu1 %v1376_v21 }
  0x64   : > { %923 = vmatprep.subr.bf16.mxu0 %v1391_v2  ;;  %1233 = vmatprep.subr.bf16.mxu1 %v1391_v2 }
  0x65   : > { %1206 = vmatprep.mubr.msk.bf16.mxu0 %vm698_vm0, %v1423_v0  ;;  %1207 = vmatprep.mubr.msk.bf16.mxu1 %vm698_vm0, %v1501_v49  ;;  %v1380_v0 = vld [vmem:[%s1449_s27 + $0x1d0] ss:$36 sps:$4 sm:$0xff]  }
  0x67   : > { %924 = vmatpush1.bf16.msra.mxu0 %v1377_v22  ;;  %1242 = vmatpush1.bf16.msra.mxu1 %v1377_v22 }
  0x68   : > { %925 = vmatprep.subr.bf16.mxu0 %v1391_v2  ;;  %1234 = vmatprep.subr.bf16.mxu1 %v1391_v2 }
  0x6b   : > { %926 = vmatpush1.bf16.msra.mxu0 %v1378_v23  ;;  %1243 = vmatpush1.bf16.msra.mxu1 %v1378_v23 }
  0x6c   : > { %927 = vmatprep.subr.bf16.mxu0 %v1391_v2  ;;  %1235 = vmatprep.subr.bf16.mxu1 %v1391_v2 }
  0x6f   : > { %928 = vmatpush1.bf16.msra.mxu0 %v1379_v24  ;;  %1244 = vmatpush1.bf16.msra.mxu1 %v1379_v24 }
  0x70   : > { %929 = vmatprep.subr.bf16.mxu0 %v1391_v2  ;;  %1236 = vmatprep.subr.bf16.mxu1 %v1391_v2 }
  0x73   : > { %930 = vmatpush1.bf16.msra.mxu0 %v1380_v0  ;;  %1245 = vmatpush1.bf16.msra.mxu1 %v1380_v0 }
  0x74   : > { %931 = vmatprep.subr.bf16.mxu0 %v1391_v2  ;;  %1237 = vmatprep.subr.bf16.mxu1 %v1391_v2 }
  0x77   : > { %932 = vmatpush1.bf16.msra.mxu0 %v1381_v25  ;;  %1246 = vmatpush1.bf16.msra.mxu1 %v1381_v25 }
  0x78   : > { %933 = vmatprep.subr.bf16.mxu0 %v1391_v2  ;;  %1238 = vmatprep.subr.bf16.mxu1 %v1391_v2 }
  0x7b   : > { %934 = vmatpush1.bf16.msra.mxu0 %v1382_v26  ;;  %1247 = vmatpush1.bf16.msra.mxu1 %v1382_v26 }
  0x7e   : > { %950 = vmatmul.mubr.bf16.vlgmr.msra.gmra.mrb[16].mxu0 %v1492_v44  ;;  %958 = vmatmul.mubr.bf16.vlgmr.msra.gmra.mrb[16].mxu1 %v1514_v54 }
  0x87   : > { %v1015_v24 = vpop.permute.xlu1 %1014  ;;  %v1005_v0 = vpop.permute.xlu0 %1004 }
 0x109   : > { %v739_v27 = vpop.f32.mrb[0].mxu0  ;;  %v792_v28 = vpop.f32.mrb[0].mxu1 }
 0x10a   : > { %v741_v29 = vpop.f32.mrb[1].mxu0  ;;  %v794_v30 = vpop.f32.mrb[1].mxu1 }
 0x10b   : > { %v966_v31 = vmax.f32 %v739_v27, %v741_v29  ;;  %v743_v32 = vpop.f32.mrb[2].mxu0  ;;  %v796_v33 = vpop.f32.mrb[2].mxu1 }
 0x10c   : > { %v745_v34 = vpop.f32.mrb[3].mxu0  ;;  %v798_v35 = vpop.f32.mrb[3].mxu1 }
 0x10d   : > { %v970_v36 = vmax.f32 %v966_v31, %v792_v28  ;;  %v967_v37 = vmax.f32 %v743_v32, %v745_v34 }
 0x10f   : > { %v974_v38 = vmax.f32 %v970_v36, %v794_v30  ;;  %v971_v39 = vmax.f32 %v967_v37, %v796_v33 }
 0x111   : > { %v975_v2 = vmax.f32 %v971_v39, %v798_v35  ;;  %v749_v40 = vpop.f32.mrb[4].mxu0  ;;  %v802_v41 = vpop.f32.mrb[4].mxu1 }
 0x112   : > { %v751_v42 = vpop.f32.mrb[5].mxu0  ;;  %v804_v43 = vpop.f32.mrb[5].mxu1 }
 0x113   : > { %v968_v44 = vmax.f32 %v749_v40, %v751_v42  ;;  %v753_v45 = vpop.f32.mrb[6].mxu0  ;;  %v806_v46 = vpop.f32.mrb[6].mxu1 }
 0x114   : > { %v755_v47 = vpop.f32.mrb[7].mxu0  ;;  %v808_v48 = vpop.f32.mrb[7].mxu1 }
 0x115   : > { %v969_v49 = vmax.f32 %v753_v45, %v755_v47  ;;  %v972_v50 = vmax.f32 %v968_v44, %v802_v41  ;;  %v1020_v39 = vpop.permute.xlu1 %1019 }
 0x117   : > { %v976_v51 = vmax.f32 %v972_v50, %v804_v43  ;;  %v973_v52 = vmax.f32 %v969_v49, %v806_v46 }
 0x119   : > { %v977_v53 = vmax.f32 %v973_v52, %v808_v48 }
 0x12d   : > { %v845_v54 = vpop.f32.mrb[8].mxu0  ;;  %v898_v55 = vpop.f32.mrb[8].mxu1 }
 0x12e   : > { %v978_v56 = vmax.f32 %v974_v38, %v845_v54  ;;  %v847_v57 = vpop.f32.mrb[9].mxu0  ;;  %v900_v58 = vpop.f32.mrb[9].mxu1 }
 0x12f   : > { %v849_v59 = vpop.f32.mrb[10].mxu0  ;;  %v902_v60 = vpop.f32.mrb[10].mxu1 }
 0x130   : > { %v982_v61 = vmax.f32 %v978_v56, %v847_v57  ;;  %v979_v62 = vmax.f32 %v975_v2, %v849_v59  ;;  %v851_v63 = vpop.f32.mrb[11].mxu0  ;;  %v904_v1 = vpop.f32.mrb[11].mxu1 }
 0x131   : > { %v1010_v2 = vpop.permute.xlu0 %1009 }
 0x132   : > { %v986_v3 = vmax.f32 %v982_v61, %v898_v55  ;;  %v983_v4 = vmax.f32 %v979_v62, %v851_v63 }
 0x134   : > { %v990_v5 = vmax.f32 %v986_v3, %v900_v58  ;;  %v987_v6 = vmax.f32 %v983_v4, %v902_v60 }
 0x135   : > { %v855_v7 = vpop.f32.mrb[12].mxu0  ;;  %v908_v8 = vpop.f32.mrb[12].mxu1 }
 0x136   : > { %v991_v9 = vmax.f32 %v987_v6, %v904_v1  ;;  %v980_v10 = vmax.f32 %v976_v51, %v855_v7  ;;  %v857_v11 = vpop.f32.mrb[13].mxu0  ;;  %v910_v12 = vpop.f32.mrb[13].mxu1 }
 0x137   : > { %v859_v13 = vpop.f32.mrb[14].mxu0  ;;  %v912_v14 = vpop.f32.mrb[14].mxu1 }
 0x138   : > { %v984_v15 = vmax.f32 %v980_v10, %v857_v11  ;;  %v981_v16 = vmax.f32 %v977_v53, %v859_v13  ;;  %v861_v17 = vpop.f32.mrb[15].mxu0  ;;  %v914_v18 = vpop.f32.mrb[15].mxu1 }
 0x13a   : > { %v985_v19 = vmax.f32 %v981_v16, %v861_v17  ;;  %v988_v20 = vmax.f32 %v984_v15, %v908_v8 }
 0x13c   : > { %v992_v21 = vmax.f32 %v988_v20, %v910_v12  ;;  %v989_v22 = vmax.f32 %v985_v19, %v912_v14 }
 0x13e   : > { %v993_v23 = vmax.f32 %v989_v22, %v914_v18 }
 0x151   : > { %v951_v25 = vpop.f32.mrb[16].mxu0  ;;  %v959_v26 = vpop.f32.mrb[16].mxu1 }
 0x152   : > { %v994_v27 = vmax.f32 %v990_v5, %v951_v25  ;;  %v996_v28 = vmax.f32 %v992_v21, %v959_v26  ;;  %v953_v29 = vpop.f32.mrb[17].mxu0  ;;  %v961_v30 = vpop.f32.mrb[17].mxu1 }
 0x153   : > { %v954_v31 = vpop.f32.mrb[18].mxu0  ;;  %v962_v32 = vpop.f32.mrb[18].mxu1 }
 0x154   : > { %v1022_v33 = vadd.f32 %v1005_v0, %v994_v27  ;;  %v1024_v34 = vadd.f32 %v1015_v24, %v996_v28  ;;  %v995_v35 = vmax.f32 %v991_v9, %v954_v31  ;;  %v997_v36 = vmax.f32 %v993_v23, %v962_v32  ;;  %v956_v37 = vpop.f32.mrb[19].mxu0  ;;  %v964_v38 = vpop.f32.mrb[19].mxu1 }
 0x156   : > { %v1023_v40 = vadd.f32 %v1010_v2, %v995_v35  ;;  %v1025_v41 = vadd.f32 %v1020_v39, %v997_v36  ;;  %v1026_v42 = vmax.f32 %v1022_v33, 0.0  ;;  %v1028_v43 = vmax.f32 %v1024_v34, 0.0 }
 0x158   : > { %v1027_v44 = vmax.f32 %v1023_v40, 0.0  ;;  %v1029_v45 = vmax.f32 %v1025_v41, 0.0 }
 0x15a   : > { %v1222_v46 = vpack.c.bf16 %v1027_v44, %v1026_v42  ;;  %v1227_v47 = vpack.c.bf16 %v1029_v45, %v1028_v43 }
 0x15c   : > { %1223 = vst [vmem:[%s170_s10] sm:$0xff] %v1222_v46   ;;  %1229 = vst [vmem:[%s170_s10 + $0x8] sm:$0xff] %v1227_v47  }
 0x15d PF: > { %s13_s12 = sadd.s32 1, %s1389_s12  }
 0x15e   : > { %p10_p4 = scmp.ge.s32.totalorder %s13_s12, 4  }
 0x160   :  { %12 = sbr.rel (!%p10_p4) target bundleno = 1 (0x1), region = 62 }

// kernel: keypoint_model_forward.5
= control target key start
LH: loop header
LB: loop body
LE: loop exit
PB: predicated region body
PF: predicated region fallthrough
CT: control target
= control target key end

     0   :  { %v1357_v2 = vmov 0.0   ;;  %vm1358_vm0 = vmmov 0   ;;  %vm266_vm1 = vcmask 261120   ;;  %s1676_s0 = inlined_call_operand.vmem [shape: bf16[72,288], index: 0, kind: input, shape index: {}]   ;;  %s1677_s1 = inlined_call_operand.vmem [shape: bf16[288,64], index: 1, kind: input, shape index: {}]   ;;  %s1678_s2 = inlined_call_operand.vmem [shape: f32[1,64], index: 2, kind: input, shape index: {}]   ;;  %s1679_s3 = inlined_call_operand.vmem [shape: bf16[4,64,128], index: 3, kind: input, shape index: {}]   ;;  %s1680_s4 = inlined_call_operand.vmem [shape: f32[1,128], index: 4, kind: input, shape index: {}]   ;;  %s1681_s5 = inlined_call_operand.vmem [shape: bf16[128,64], index: 5, kind: input, shape index: {}]   ;;  %s1682_s6 = inlined_call_operand.vmem [shape: f32[1,64], index: 6, kind: input, shape index: {}]   ;;  %s1683_s7 = inlined_call_operand.vmem [shape: bf16[64,30], index: 7, kind: input, shape index: {}]   ;;  %s1684_s8 = inlined_call_operand.vmem [shape: f32[1,30], index: 8, kind: input, shape index: {}]   ;;  %s1685_s9 = inlined_call_operand.hbm [shape: f32[2,30], index: 9, kind: output, shape index: {}]  }
   0x1   :  { %v1268_v0 = vld [vmem:[%s1677_s1 + $0x40] sm:$0xff]   ;;  %1161 = vmatprep.subr.bf16.mxu1 %v1357_v2  ;;  %v1270_v3 = vld [vmem:[%s1677_s1 + $0x48] sm:$0xff]   ;;  %1165 = vmatprep.mubr.msk.bf16.mxu1 %vm1358_vm0, %v1357_v2  ;;  %v1272_v5 = vld [vmem:[%s1677_s1 + $0x50] sm:$0xff]  }
   0x2   :  { %v1269_v1 = vld [vmem:[%s1677_s1] sm:$0xff]   ;;  %1074 = vmatprep.subr.bf16.mxu0 %v1268_v0  ;;  %v1271_v4 = vld [vmem:[%s1677_s1 + $0x8] sm:$0xff]   ;;  %v1273_v6 = vld [vmem:[%s1677_s1 + $0x10] sm:$0xff]  }
   0x3   :  { %1075 = vmatpush3.bf16.msra.mxu0 %v1269_v1  ;;  %v1274_v7 = vld [vmem:[%s1677_s1 + $0x58] sm:$0xff]   ;;  %v1276_v9 = vld [vmem:[%s1677_s1 + $0x60] sm:$0xff]   ;;  %v1278_v12 = vld [vmem:[%s1677_s1 + $0x68] sm:$0xff]  }
   0x4   :  { %1076 = vmatprep.subr.bf16.mxu0 %v1270_v3  ;;  %v1275_v8 = vld [vmem:[%s1677_s1 + $0x18] sm:$0xff]   ;;  %v1282_v10 = vld [vmem:[%s1677_s1 + $0x80] sm:$0xff]   ;;  %v1279_v13 = vld [vmem:[%s1677_s1 + $0x28] sm:$0xff]  }
   0x5   :  { %v1277_v11 = vld [vmem:[%s1677_s1 + $0x20] sm:$0xff]   ;;  %1162 = vmatpush3.bf16.msra.mxu1 %v1282_v10  ;;  %v1285_v14 = vld [vmem:[%s1677_s1 + $0x88] sm:$0xff]   ;;  %v1280_v15 = vld [vmem:[%s1677_s1 + $0x70] sm:$0xff]  }
   0x6   :  { %1163 = vmatprep.subr.bf16.mxu1 %v1357_v2  ;;  %v1288_v16 = vld [vmem:[%s1676_s0 + $0x4] ss:$12 sps:$4 sm:$0xff]   ;;  %v1289_v17 = vld [vmem:[%s1676_s0 + $0x8] ss:$12 sps:$4 sm:$0xff]   ;;  %v1283_v19 = vld [vmem:[%s1677_s1 + $0x78] sm:$0xff]  }
   0x7   :  { %1077 = vmatpush3.bf16.msra.mxu0 %v1271_v4  ;;  %314 = vmatprep.mubr.bf16.mxu0 %v1288_v16  ;;  %v1281_v18 = vld [vmem:[%s1677_s1 + $0x30] sm:$0xff]   ;;  %v1284_v20 = vld [vmem:[%s1677_s1 + $0x38] sm:$0xff]   ;;  %v1293_v21 = vld [vmem:[%s1676_s0 + $0x20] ss:$12 sps:$4 sm:$0xff]  }
   0x8   :  { %1078 = vmatprep.subr.bf16.mxu0 %v1272_v5  ;;  %v1286_v22 = vld [vmem:[%s1676_s0] ss:$12 sps:$4 sm:$0xff]   ;;  %v1290_v23 = vld [vmem:[%s1676_s0 + $0x1c] ss:$12 sps:$4 sm:$0xff]   ;;  %v1297_v24 = vld [vmem:[%s1676_s0 + $0x38] ss:$12 sps:$4 sm:$0xff]  }
   0x9   :  { %1164 = vmatpush3.bf16.msra.mxu1 %v1285_v14  ;;  %v1292_v25 = vld [vmem:[%s1676_s0 + $0x18] ss:$12 sps:$4 sm:$0xff]   ;;  %v1294_v26 = vld [vmem:[%s1676_s0 + $0x34] ss:$12 sps:$4 sm:$0xff]   ;;  %v1301_v27 = vld [vmem:[%s1676_s0 + $0x50] ss:$12 sps:$4 sm:$0xff]  }
   0xa   :  { %1185 = vmatprep.subr.bf16.mxu1 %v1357_v2  ;;  %v1296_v28 = vld [vmem:[%s1676_s0 + $0x30] ss:$12 sps:$4 sm:$0xff]   ;;  %v1298_v29 = vld [vmem:[%s1676_s0 + $0x4c] ss:$12 sps:$4 sm:$0xff]  }
   0xb   :  { %1079 = vmatpush3.bf16.msra.mxu0 %v1273_v6 }
   0xc   :  { %1080 = vmatprep.subr.bf16.mxu0 %v1274_v7  ;;  %1166 = vmatmul.mubr.msk.bf16.vlgmr.msra.gmra.mrb[0].mxu1 %vm266_vm1, %v1289_v17 }
   0xd   :  { %1169 = vmatprep.mubr.msk.bf16.mxu1 %vm1358_vm0, %v1357_v2 }
   0xf   :  { %1081 = vmatpush3.bf16.msra.mxu0 %v1275_v8 }
  0x10   :  { %1082 = vmatprep.subr.bf16.mxu0 %v1276_v9 }
  0x13   :  { %1083 = vmatpush3.bf16.msra.mxu0 %v1277_v11 }
  0x14   :  { %1084 = vmatprep.subr.bf16.mxu0 %v1278_v12  ;;  %1170 = vmatmul.mubr.msk.bf16.gmra.mrb[4].mxu1 %vm266_vm1, %v1293_v21 }
  0x15   :  { %1173 = vmatprep.mubr.msk.bf16.mxu1 %vm1358_vm0, %v1357_v2 }
  0x17   :  { %1085 = vmatpush3.bf16.msra.mxu0 %v1279_v13 }
  0x18   :  { %1086 = vmatprep.subr.bf16.mxu0 %v1280_v15 }
  0x1b   :  { %1087 = vmatpush3.bf16.msra.mxu0 %v1281_v18 }
  0x1c   :  { %1088 = vmatprep.subr.bf16.mxu0 %v1283_v19  ;;  %1174 = vmatmul.mubr.msk.bf16.gmra.mrb[8].mxu1 %vm266_vm1, %v1297_v24 }
  0x1d   :  { %1177 = vmatprep.mubr.msk.bf16.mxu1 %vm1358_vm0, %v1357_v2 }
  0x1f   :  { %1089 = vmatpush3.bf16.msra.mxu0 %v1284_v20 }
  0x20   :  { %1209 = vmatprep.subr.bf16.mxu0 %v1357_v2 }
  0x22   :  { %315 = vmatmul.mubr.bf16.vlgmr.msra.gmra.mrb[0].mxu0 %v1286_v22 }
  0x23   :  { %322 = vmatprep.mubr.bf16.mxu0 %v1290_v23 }
  0x24   :  { %1178 = vmatmul.mubr.msk.bf16.gmra.mrb[12].mxu1 %vm266_vm1, %v1301_v27 }
  0x2a   :  { %323 = vmatmul.mubr.bf16.gmra.mrb[4].mxu0 %v1292_v25 }
  0x2b   :  { %330 = vmatprep.mubr.bf16.mxu0 %v1294_v26 }
  0x2c   :  { %14 = vsyncpa [#allocation3], 0  ;;  %1181 = vmatprep.mubr.msk.bf16.mxu1 %vm1358_vm0, %v1357_v2  ;;  %v1304_v30 = vld [vmem:[%s1676_s0 + $0x68] ss:$0 sps:$4 sm:$0xff]   ;;  %v50_v31 = vld [vmem:[%s1676_s0 + $0x60] sm:$0xff]  ;;  %vm487_vm2 = vcmask 523264  }
  0x2d   :  { %v1300_v32 = vld [vmem:[%s1676_s0 + $0x48] ss:$12 sps:$4 sm:$0xff]   ;;  %v988_v33 = vcombine.high %v50_v31, %v50_v31  ;;  %1182 = vmatmul.mubr.msk.bf16.gmra.mrb[16].mxu1 %vm266_vm1, %v1304_v30  ;;  %v987_v34 = vcombine.low %v50_v31, %v50_v31  ;;  %v1305_v35 = vld [vmem:[%s1679_s3 + $0x20] sm:$0xff]   ;;  %v1310_v41 = vld [vmem:[%s1679_s3 + $0x38] sm:$0xff]   ;;  %s1359_s20 = smov [#allocation2]   ;;  %vm959_vm3 = vcmask 238592  }
  0x2e   :  { %1193 = vmatprep.mubr.msk.bf16.mxu1 %vm1358_vm0, %v1357_v2  ;;  %1186 = vmatpush3.bf16.msra.mxu1 %v1305_v35  ;;  %v1306_v36 = vld [vmem:[%s1679_s3 + $0x28] sm:$0xff]   ;;  %v1308_v37 = vld [vmem:[%s1679_s3 + $0x40] sm:$0xff]   ;;  %v1307_v38 = vld [vmem:[%s1679_s3 + $0x30] sm:$0xff]  }
  0x2f   :  { %1187 = vmatprep.subr.bf16.mxu1 %v1357_v2  ;;  %1210 = vmatpush3.bf16.msra.mxu0 %v1308_v37  ;;  %v1309_v39 = vld [vmem:[%s1679_s3 + $0x48] sm:$0xff]   ;;  %v1311_v40 = vld [vmem:[%s1679_s3 + $0x50] sm:$0xff]   ;;  %v1312_v42 = vld [vmem:[%s1679_s3 + $0x58] sm:$0xff]  }
  0x30   :  { %1211 = vmatprep.subr.bf16.mxu0 %v1357_v2 }
  0x32   :  { %331 = vmatmul.mubr.bf16.gmra.mrb[8].mxu0 %v1296_v28  ;;  %1188 = vmatpush3.bf16.msra.mxu1 %v1306_v36 }
  0x33   :  { %338 = vmatprep.mubr.bf16.mxu0 %v1298_v29  ;;  %1189 = vmatprep.subr.bf16.mxu1 %v1357_v2 }
  0x34   :  { %1212 = vmatpush3.bf16.msra.mxu0 %v1309_v39 }
  0x35   :  { %1213 = vmatprep.subr.bf16.mxu0 %v1357_v2 }
  0x36   :  { %1190 = vmatpush3.bf16.msra.mxu1 %v1307_v38 }
  0x37   :  { %1191 = vmatprep.subr.bf16.mxu1 %v1357_v2 }
  0x38   :  { %1214 = vmatpush3.bf16.msra.mxu0 %v1311_v40 }
  0x39   :  { %1215 = vmatprep.subr.bf16.mxu0 %v1357_v2 }
  0x3a   :  { %339 = vmatmul.mubr.bf16.gmra.mrb[12].mxu0 %v1300_v32  ;;  %1192 = vmatpush3.bf16.msra.mxu1 %v1310_v41 }
  0x3b   :  { %346 = vmatprep.mubr.bf16.mxu0 %v988_v33  ;;  %1197 = vmatprep.subr.bf16.mxu1 %v1357_v2 }
  0x3c   :  { %1216 = vmatpush3.bf16.msra.mxu0 %v1312_v42 }
  0x3d   :  { %1233 = vmatprep.subr.bf16.mxu0 %v1357_v2 }
  0x42   :  { %347 = vmatmul.mubr.bf16.gmra.mrb[16].mxu0 %v987_v34 }
  0x43   :  { %1217 = vmatprep.mubr.msk.bf16.mxu0 %vm1358_vm0, %v1357_v2 }
  0xdf   :  { %v388_v43 = vpop.f32.mrb[0].mxu1 }
  0xe0   :  { %v1167_v44 = vpop.f32.mrb[1].mxu1 }
  0xe1   :  { %v391_v45 = vpop.f32.mrb[2].mxu1 }
  0xe2   :  { %v1168_v46 = vpop.f32.mrb[3].mxu1 }
  0xe7   :  { %v396_v47 = vpop.f32.mrb[4].mxu1 }
  0xe8   :  { %v1171_v48 = vpop.f32.mrb[5].mxu1 }
  0xe9   :  { %v399_v49 = vpop.f32.mrb[6].mxu1 }
  0xea   :  { %v1172_v51 = vpop.f32.mrb[7].mxu1 }
  0xef   :  { %v404_v58 = vpop.f32.mrb[8].mxu1 }
  0xf0   :  { %v1175_v60 = vpop.f32.mrb[9].mxu1 }
  0xf1   :  { %v407_v61 = vpop.f32.mrb[10].mxu1 }
  0xf2   :  { %v1176_v0 = vpop.f32.mrb[11].mxu1 }
  0xf3   :  { %v1324_v0 = vld [vmem:[%s1681_s5 + $0x18] sm:$0xff]  }
  0xf5   :  { %v1090_v50 = vpop.f32.mrb[0].mxu0 }
  0xf6   :  { %v1091_v52 = vpop.f32.mrb[1].mxu0 }
  0xf7   :  { %v1092_v53 = vadd.f32 %v1091_v52, %v1090_v50  ;;  %v1093_v54 = vpop.f32.mrb[2].mxu0  ;;  %v412_v8 = vpop.f32.mrb[12].mxu1  ;;  %v1313_v50 = vld [vmem:[%s1679_s3] sm:$0xff]  }
  0xf8   :  { %v1094_v55 = vpop.f32.mrb[3].mxu0  ;;  %v1179_v11 = vpop.f32.mrb[13].mxu1 }
  0xf9   :  { %v389_v56 = vadd.f32 %v1092_v53, %v388_v43  ;;  %v1095_v57 = vadd.f32 %v1094_v55, %v1093_v54  ;;  %v415_v12 = vpop.f32.mrb[14].mxu1  ;;  %v1314_v53 = vld [vmem:[%s1679_s3 + $0x8] sm:$0xff]   ;;  %v1315_v54 = vld [vmem:[%s1679_s3 + $0x10] sm:$0xff]   ;;  %v1316_v55 = vld [vmem:[%s1679_s3 + $0x18] sm:$0xff]  }
  0xfa   :  { %v1180_v15 = vpop.f32.mrb[15].mxu1 }
  0xfb   :  { %v392_v59 = vadd.f32 %v1095_v57, %v391_v45  ;;  %v1013_v45 = vld [vmem:[%s1678_s2] ss:$0 sm:$0xff]  ;;  %v1318_v57 = vld [vmem:[%s1679_s3 + $0x68] sm:$0xff]  }
  0xfd   :  { %v426_v62 = vmax.f32 %v389_v56, %v392_v59  ;;  %v1096_v63 = vpop.f32.mrb[4].mxu0  ;;  %v1317_v56 = vld [vmem:[%s1679_s3 + $0x60] sm:$0xff]   ;;  %v1320_v59 = vld [vmem:[%s1679_s3 + $0x78] sm:$0xff]  }
  0xfe   :  { %v1097_v1 = vpop.f32.mrb[5].mxu0 }
  0xff   :  { %v1098_v3 = vadd.f32 %v1097_v1, %v1096_v63  ;;  %v1099_v4 = vpop.f32.mrb[6].mxu0  ;;  %v1323_v63 = vld [vmem:[%s1681_s5 + $0x10] sm:$0xff]   ;;  %v1325_v1 = vld [vmem:[%s1681_s5 + $0x20] sm:$0xff]  }
 0x100   :  { %v1100_v5 = vpop.f32.mrb[7].mxu0  ;;  %v420_v22 = vpop.f32.mrb[16].mxu1 }
 0x101   :  { %v397_v6 = vadd.f32 %v1098_v3, %v396_v47  ;;  %v1101_v7 = vadd.f32 %v1100_v5, %v1099_v4  ;;  %v1183_v25 = vpop.f32.mrb[17].mxu1  ;;  %v1326_v3 = vld [vmem:[%s1681_s5 + $0x28] sm:$0xff]   ;;  %v1327_v4 = vld [vmem:[%s1681_s5 + $0x30] sm:$0xff]   ;;  %v1328_v5 = vld [vmem:[%s1681_s5 + $0x38] sm:$0xff]  }
 0x102   :  { %v423_v26 = vpop.f32.mrb[18].mxu1 }
 0x103   :  { %v427_v9 = vmax.f32 %v426_v62, %v397_v6  ;;  %v400_v10 = vadd.f32 %v1101_v7, %v399_v49  ;;  %v1184_v29 = vpop.f32.mrb[19].mxu1  ;;  %v1322_v62 = vld [vmem:[%s1681_s5 + $0x8] sm:$0xff]   ;;  %v1329_v6 = vld [vmem:[%s1683_s7] sm:$0xff]  }
 0x104   :  { %v1330_v7 = vld [vmem:[%s1683_s7 + $0x8] sm:$0xff]  }
 0x105   :  { %v428_v13 = vmax.f32 %v427_v9, %v400_v10  ;;  %v1102_v14 = vpop.f32.mrb[8].mxu0 }
 0x106   :  { %v1103_v16 = vpop.f32.mrb[9].mxu0 }
 0x107   :  { %v1104_v17 = vadd.f32 %v1103_v16, %v1102_v14  ;;  %v1105_v18 = vpop.f32.mrb[10].mxu0 }
 0x108   :  { %v1106_v19 = vpop.f32.mrb[11].mxu0 }
 0x109   :  { %v405_v20 = vadd.f32 %v1104_v17, %v404_v58  ;;  %v1107_v21 = vadd.f32 %v1106_v19, %v1105_v18  ;;  %v1319_v58 = vld [vmem:[%s1679_s3 + $0x70] sm:$0xff]  }
 0x10b   :  { %v429_v23 = vmax.f32 %v428_v13, %v405_v20  ;;  %v408_v24 = vadd.f32 %v1107_v21, %v407_v61  ;;  %v1321_v61 = vld [vmem:[%s1681_s5] sm:$0xff]  }
 0x10d   :  { %v430_v27 = vmax.f32 %v429_v23, %v408_v24  ;;  %v1108_v28 = vpop.f32.mrb[12].mxu0  ;;  %v1058_v23 = vld [vmem:[%s1680_s4] ss:$0 sm:$0xff] }
 0x10e   :  { %v1109_v30 = vpop.f32.mrb[13].mxu0 }
 0x10f   :  { %v1110_v31 = vadd.f32 %v1109_v30, %v1108_v28  ;;  %v1111_v32 = vpop.f32.mrb[14].mxu0 }
 0x110   :  { %v1112_v33 = vpop.f32.mrb[15].mxu0 }
 0x111   :  { %v413_v34 = vadd.f32 %v1110_v31, %v412_v8  ;;  %v1113_v35 = vadd.f32 %v1112_v33, %v1111_v32  ;;  %v1331_v31 = vld [vmem:[%s1683_s7 + $0x10] sm:$0xff]   ;;  %v1332_v32 = vld [vmem:[%s1683_s7 + $0x18] sm:$0xff]   ;;  %v1059_v33 = vld [vmem:[%s1682_s6] ss:$0 sm:$0xff]  ;;  %s967_s7 = sshll.u32 %s1359_s20, 4  ;;  %s968_s7 = int_to_ptr.vmem [resolvable:$true] %s967_s7 }
 0x112   :  { %s1333_s6 = scalar_lea.vmem %s968_s7, 32  ;;  %p1338_p1 = scmp.lt.s32.totalorder %s968_s7, %s968_s7 }
 0x113   :  { %v431_v36 = vmax.f32 %v430_v27, %v413_v34  ;;  %v416_v37 = vadd.f32 %v1113_v35, %v415_v12  ;;  %p1334_p0 = scmp.ne.s32.totalorder %s968_s7, %s1333_s6  ;;  %p1339_p2 = scmp.lt.s32.totalorder %s1333_s6, %s1333_s6 }
 0x115   :  { %v432_v38 = vmax.f32 %v431_v36, %v416_v37  ;;  %v1114_v39 = vpop.f32.mrb[16].mxu0  ;;  %p1340_p3 = por %p1339_p2, %p1338_p1 }
 0x116   :  { %v1115_v40 = vpop.f32.mrb[17].mxu0 }
 0x117   :  { %v1116_v41 = vadd.f32 %v1115_v40, %v1114_v39  ;;  %v1117_v42 = vpop.f32.mrb[18].mxu0  ;;  %p1341_p4 = pnand %p1340_p3, %p1334_p0 }
 0x118   :  { %v1118_v43 = vpop.f32.mrb[19].mxu0 }
 0x119   :  { %v421_v44 = vadd.f32 %v1116_v41, %v420_v22 }
 0x11b   :  { %v433_v46 = vmax.f32 %v432_v38, %v421_v44 }
 0x11d   :  { %v441_v47 = vadd.f32 %v1013_v45, %v433_v46 }
 0x11f   :  { %v442_v48 = vmax.f32 %v441_v47, 0.0 }
 0x121   :  { %v443_v49 = vpack.c.bf16 %v442_v48, %v442_v48 }
 0x123   :  { %v462_v51 = vrot.slane %v443_v49, 1  ;;  %v607_v52 = vrot.slane %v443_v49, 2  ;;  %v685_v60 = vrot.slane %v443_v49, 3 }
 0x125   :  { %1194 = vmatmul.mubr.msk.bf16.vlgmr.msra.gmra.mrb[20].mxu1 %vm487_vm2, %v462_v51  ;;  %1218 = vmatmul.mubr.msk.bf16.vlgmr.msra.gmra.mrb[20].mxu0 %vm487_vm2, %v607_v52 }
 0x126   :  { %1198 = vmatpush3.bf16.msra.mxu1 %v1313_v50  ;;  %1205 = vmatprep.mubr.msk.bf16.mxu1 %vm1358_vm0, %v1357_v2 }
 0x127   :  { %1199 = vmatprep.subr.bf16.mxu1 %v1357_v2  ;;  %1249 = vmatprep.mubr.msk.bf16.mxu0 %vm1358_vm0, %v1357_v2 }
 0x128   :  { %1234 = vmatpush3.bf16.msra.mxu0 %v1321_v61 }
 0x129   :  { %1235 = vmatprep.subr.bf16.mxu0 %v1357_v2 }
 0x12a   :  { %1200 = vmatpush3.bf16.msra.mxu1 %v1314_v53 }
 0x12b   :  { %1201 = vmatprep.subr.bf16.mxu1 %v1357_v2 }
 0x12c   :  { %1236 = vmatpush3.bf16.msra.mxu0 %v1322_v62 }
 0x12d   :  { %1237 = vmatprep.subr.bf16.mxu0 %v1357_v2 }
 0x12e   :  { %1202 = vmatpush3.bf16.msra.mxu1 %v1315_v54 }
 0x12f   :  { %1203 = vmatprep.subr.bf16.mxu1 %v1357_v2 }
 0x130   :  { %1238 = vmatpush3.bf16.msra.mxu0 %v1323_v63 }
 0x131   :  { %1239 = vmatprep.subr.bf16.mxu0 %v1357_v2 }
 0x132   :  { %1204 = vmatpush3.bf16.msra.mxu1 %v1316_v55 }
 0x133   :  { %1221 = vmatprep.subr.bf16.mxu1 %v1357_v2 }
 0x134   :  { %1240 = vmatpush3.bf16.msra.mxu0 %v1324_v0 }
 0x135   :  { %1206 = vmatmul.mubr.msk.bf16.vlgmr.msra.gmra.mrb[24].mxu1 %vm487_vm2, %v443_v49  ;;  %1241 = vmatprep.subr.bf16.mxu0 %v1357_v2 }
 0x136   :  { %1222 = vmatpush3.bf16.msra.mxu1 %v1317_v56  ;;  %1229 = vmatprep.mubr.msk.bf16.mxu1 %vm1358_vm0, %v1357_v2 }
 0x137   :  { %1223 = vmatprep.subr.bf16.mxu1 %v1357_v2 }
 0x138   :  { %1242 = vmatpush3.bf16.msra.mxu0 %v1325_v1 }
 0x139   :  { %1243 = vmatprep.subr.bf16.mxu0 %v1357_v2 }
 0x13a   :  { %1224 = vmatpush3.bf16.msra.mxu1 %v1318_v57 }
 0x13b   :  { %1225 = vmatprep.subr.bf16.mxu1 %v1357_v2 }
 0x13c   :  { %1244 = vmatpush3.bf16.msra.mxu0 %v1326_v3 }
 0x13d   :  { %1245 = vmatprep.subr.bf16.mxu0 %v1357_v2 }
 0x13e   :  { %1226 = vmatpush3.bf16.msra.mxu1 %v1319_v58 }
 0x13f   :  { %1227 = vmatprep.subr.bf16.mxu1 %v1357_v2 }
 0x140   :  { %1246 = vmatpush3.bf16.msra.mxu0 %v1327_v4 }
 0x141   :  { %1247 = vmatprep.subr.bf16.mxu0 %v1357_v2 }
 0x142   :  { %1228 = vmatpush3.bf16.msra.mxu1 %v1320_v59 }
 0x143   :  { %1253 = vmatprep.subr.bf16.mxu1 %v1357_v2 }
 0x144   :  { %1248 = vmatpush3.bf16.msra.mxu0 %v1328_v5 }
 0x145   :  { %1230 = vmatmul.mubr.msk.bf16.vlgmr.msra.gmra.mrb[28].mxu1 %vm487_vm2, %v685_v60 }
 0x146   :  { %1261 = vmatprep.mubr.msk.bf16.mxu1 %vm1358_vm0, %v1357_v2  ;;  %1254 = vmatpush3.bf16.msra.mxu1 %v1329_v6 }
 0x147   :  { %1255 = vmatprep.subr.bf16.mxu1 %v1357_v2 }
 0x14a   :  { %1256 = vmatpush3.bf16.msra.mxu1 %v1330_v7 }
 0x14b   :  { %1257 = vmatprep.subr.bf16.mxu1 %v1357_v2 }
 0x14e   :  { %1258 = vmatpush3.bf16.msra.mxu1 %v1331_v31 }
 0x14f   :  { %1259 = vmatprep.subr.bf16.mxu1 %v1357_v2  ;;  %v1068_v2 = vld [vmem:[%s1684_s8] ss:$0 sm:$0xff] }
 0x152   :  { %1260 = vmatpush3.bf16.msra.mxu1 %v1332_v32 }
 0x1f8   :  { %v525_v8 = vpop.f32.mrb[20].mxu1  ;;  %v669_v9 = vpop.f32.mrb[20].mxu0 }
 0x1f9   :  { %v1195_v10 = vpop.f32.mrb[21].mxu1  ;;  %v1219_v11 = vpop.f32.mrb[21].mxu0 }
 0x1fa   :  { %v528_v12 = vpop.f32.mrb[22].mxu1  ;;  %v672_v13 = vpop.f32.mrb[22].mxu0 }
 0x1fb   :  { %v1196_v14 = vpop.f32.mrb[23].mxu1  ;;  %v1220_v15 = vpop.f32.mrb[23].mxu0 }
 0x208   :  { %v592_v16 = vpop.f32.mrb[24].mxu1 }
 0x209   :  { %v593_v17 = vadd.f32 %v592_v16, %v525_v8  ;;  %v1207_v18 = vpop.f32.mrb[25].mxu1 }
 0x20a   :  { %v595_v19 = vpop.f32.mrb[26].mxu1 }
 0x20b   :  { %v1208_v20 = vpop.f32.mrb[27].mxu1  ;;  %v675_v21 = vadd.f32 %v669_v9, %v593_v17 }
 0x218   :  { %v747_v22 = vpop.f32.mrb[28].mxu1 }
 0x219   :  { %v753_v24 = vadd.f32 %v747_v22, %v675_v21  ;;  %v1231_v25 = vpop.f32.mrb[29].mxu1 }
 0x21a   :  { %v750_v26 = vpop.f32.mrb[30].mxu1 }
 0x21b   :  { %v761_v27 = vadd.f32 %v1058_v23, %v753_v24  ;;  %v1232_v28 = vpop.f32.mrb[31].mxu1 }
 0x21d   :  { %v762_v29 = vmax.f32 %v761_v27, 0.0 }
 0x21f   :  { %v763_v30 = vpack.c.bf16 %v762_v29, %v762_v29 }
 0x221   :  { %1250 = vmatmul.mubr.bf16.vlgmr.msra.gmra.mrb[24].mxu0 %v763_v30 }
 0x2f4   :  { %v869_v34 = vpop.f32.mrb[24].mxu0 }
 0x2f5   :  { %v870_v35 = vadd.f32 %v1059_v33, %v869_v34  ;;  %v1251_v36 = vpop.f32.mrb[25].mxu0 }
 0x2f6   :  { %v872_v37 = vpop.f32.mrb[26].mxu0 }
 0x2f7   :  { %v875_v38 = vmax.f32 %v870_v35, 0.0  ;;  %v1252_v39 = vpop.f32.mrb[27].mxu0 }
 0x2f9   :  { %v876_v40 = vpack.c.bf16 %v875_v38, %v875_v38 }
 0x2fb   :  { %1262 = vmatmul.mubr.msk.bf16.vlgmr.msra.gmra.mrb[32].mxu1 %vm487_vm2, %v876_v40 }
 0x3ce   :  { %v953_v41 = vpop.f32.mrb[32].mxu1 }
 0x3cf   :  { %v954_v42 = vadd.f32 %v1068_v2, %v953_v41  ;;  %v1263_v43 = vpop.f32.mrb[33].mxu1 }
 0x3d0   :  { %v956_v44 = vpop.f32.mrb[34].mxu1 }
 0x3d1   :  { %v1264_v45 = vpop.f32.mrb[35].mxu1  ;;  %960 = vst.msk [vmem:[#allocation2] sm:$0x3] %vm959_vm3, %v954_v42 }
 0x3d2   :  { %1344 = shalt.err (!%p1341_p4)
}
 0x3d3   :  { %s1345_s8 = scalar_lea.hbm %s1685_s9, 32 }
 0x3d4   :  { %p1346_p5 = scmp.ne.s32.totalorder %s1685_s9, %s1345_s8  ;;  %p1349_p6 = scmp.lt.u32.totalorder %s1345_s8, %s1685_s9 }
 0x3d6   :  { %p1351_p7 = pnand %p1349_p6, %p1346_p5 }
 0x3d8   :  { %1354 = shalt.err (!%p1351_p7)
}
 0x3d9   :  { %970 = dma.vmem_to_hbm [thread:$0]  %s968_s7, 32, %s1685_s9, [#allocation3]  }
 0x3da   :  { %1355 = dma.done.wait [#allocation3], 32  }
 0x3db   :  { %1356 = vsyncadd [#allocation3], 4294967264 }
 0x3dc   :  { %974 = vsyncpa [#allocation3], 1 }

</bundles_post_ra>
